<compile_context>
chip_gen: v7x
topology: tpu7x:2x2x1
jax: 0.10.0
libtpu: 0.0.40
codegen_flags: <defaults>
</compile_context>

<pallas_src>
import functools

import jax
import jax.numpy as jnp
from jax.experimental import pallas as pl
from jax.experimental.pallas import tpu as pltpu


PAD_VAL = 0.45  # raw pixel value whose normalized value is exactly 0

# overall per-column pose scale: 0.1 base, then [:3] *= 0.1, [-1] *= 0.5
POSE_SCALE = jnp.array([0.01, 0.01, 0.01, 0.1, 0.1, 0.05], jnp.float32)


# ---------------------------------------------------------------------------
# Pallas kernels
# ---------------------------------------------------------------------------
def _fused_depth_kernel(x_ref, mask_ref, w1_ref, b1_ref, w2_ref, b2_ref,
                        o_ref, h_ref, *, row_stride):
    """depth_net = conv3x3(relu) -> conv3x3(sigmoid), fully fused in VMEM.

    Channel-first canvas-flat layout: the (H+2)x(W+2) zero-pad canvas is
    flattened row-major onto the lane axis with `row_stride = W+2`, so a conv
    tap (kh, kw) is the constant lane shift s = (kh-1)*row_stride + (kw-1).
    Input normalization is folded into w1/b1 (canvas/apron pad = raw 0.45).

      x_ref   : (1, Cin, M0)  canvas + apron (raw pixels)
      mask_ref: (1, M1)       1.0 on true image pixels, 0.0 elsewhere
      w1_ref  : (9, C1, Cin)  per-tap matrices, tap index kh*3+kw
      w2_ref  : (9, C2, C1)
      b1_ref  : (C1, 1), b2_ref : (C2, 1)
      o_ref   : (1, C2, Mc)   sigmoid output on the full canvas (lane-dense)
      h_ref   : (C1, M1)      VMEM scratch (masked conv1 activation)
    """
    c1, m1 = h_ref.shape
    c2, mc = o_ref.shape[1], o_ref.shape[2]
    e = row_stride + 1                       # max |tap shift|

    # conv1 (+ folded normalization) on the extended flat range [-e, mc + e)
    acc = jnp.zeros((c1, m1), jnp.float32)
    for kh in range(3):
        for kw in range(3):
            s = (kh - 1) * row_stride + (kw - 1)
            taps = x_ref[0, :, pl.ds(e + s, m1)]          # (Cin, M1), static
            acc += jnp.dot(w1_ref[kh * 3 + kw], taps,
                           preferred_element_type=jnp.float32)
    # relu, then zero everything that is not a true image pixel so the second
    # conv sees exact zero padding.  Intermediate never leaves VMEM.
    h_ref[...] = jnp.maximum(acc + b1_ref[...], 0.0) * mask_ref[...]

    # conv2 on the canvas range [0, mc)
    acc2 = jnp.zeros((c2, mc), jnp.float32)
    for kh in range(3):
        for kw in range(3):
            s = (kh - 1) * row_stride + (kw - 1)
            taps = h_ref[:, pl.ds(e + s, mc)]             # (C1, Mc)
            acc2 += jnp.dot(w2_ref[kh * 3 + kw], taps,
                            preferred_element_type=jnp.float32)
    o_ref[0] = jax.nn.sigmoid(acc2 + b2_ref[...])


def _fused_pose_kernel(x_ref, mask_ref, w1_ref, b1_ref, wfc_ref, bfc_ref,
                       o_ref, *, row_stride, inv_hw):
    """pose_net = conv3x3(relu) -> global average pool -> fc, fused in VMEM.

    The fc is applied before the spatial mean (linear ops commute), so no
    degenerate 1-lane matmul is needed.  MonoDepthPair pose scaling and input
    normalization are folded into the weights; GAP normalization is `inv_hw`.

      x_ref : (1, 6, Mc + 2e), mask_ref : (1, Mc)
      w1_ref: (9, C1, 6), b1_ref: (C1, 1), wfc_ref: (6, C1), bfc_ref: (6, 1)
      o_ref : (1, 6, 1)
    """
    c1 = w1_ref.shape[1]
    mc = mask_ref.shape[1]
    e = row_stride + 1
    acc = jnp.zeros((c1, mc), jnp.float32)
    for kh in range(3):
        for kw in range(3):
            s = (kh - 1) * row_stride + (kw - 1)
            taps = x_ref[0, :, pl.ds(e + s, mc)]
            acc += jnp.dot(w1_ref[kh * 3 + kw], taps,
                           preferred_element_type=jnp.float32)
    h = jnp.maximum(acc + b1_ref[...], 0.0) * mask_ref[...]          # (C1, Mc)
    z = jnp.dot(wfc_ref[...], h, preferred_element_type=jnp.float32)  # (6, Mc)
    o_ref[0] = jnp.sum(z, axis=1, keepdims=True) * inv_hw + bfc_ref[...]


# ---------------------------------------------------------------------------
# Layout plumbing (plain JAX, boundary only — stays channel-first / NCHW)
# ---------------------------------------------------------------------------
def _flatten_canvas(x_nchw, extra):
    """(N,C,H,W) -> (N, C, (H+2)*(W+2) + 2*extra); all padding = PAD_VAL."""
    n, c, h, w = x_nchw.shape
    canvas = jnp.pad(x_nchw, ((0, 0), (0, 0), (1, 1), (1, 1)),
                     constant_values=PAD_VAL)
    flat = canvas.reshape(n, c, (h + 2) * (w + 2))
    apron = jnp.full((n, c, extra), PAD_VAL, jnp.float32)
    return jnp.concatenate([apron, flat, apron], axis=2)


def _interior_mask(h, w, extra):
    """(1, Mc + 2*extra) f32: 1.0 at true image pixels of the flat canvas."""
    m = jnp.zeros((h + 2, w + 2), jnp.float32).at[1:h + 1, 1:w + 1].set(1.0)
    m = jnp.pad(m.reshape(-1), (extra, extra))
    return m[None, :]


def fused_depth_net(x_nchw, kp):
    """(N, Cin, H, W) raw images -> (N, C2, H, W) sigmoid depth (NCHW)."""
    n, cin, h, w = x_nchw.shape
    wc = w + 2
    mc = (h + 2) * wc
    e = wc + 1
    m1 = mc + 2 * e
    m0 = mc + 4 * e
    xf = _flatten_canvas(x_nchw, 2 * e)              # (N, Cin, M0)
    mask = _interior_mask(h, w, e)                   # (1, M1)
    w1, b1, w2, b2 = kp["dw1"], kp["db1"], kp["dw2"], kp["db2"]
    c1, c2 = w1.shape[1], w2.shape[1]
    out = pl.pallas_call(
        functools.partial(_fused_depth_kernel, row_stride=wc),
        out_shape=jax.ShapeDtypeStruct((n, c2, mc), jnp.float32),
        grid=(n,),
        in_specs=[
            pl.BlockSpec((1, cin, m0), lambda i: (i, 0, 0)),
            pl.BlockSpec((1, m1), lambda i: (0, 0)),
            pl.BlockSpec((9, c1, cin), lambda i: (0, 0, 0)),
            pl.BlockSpec((c1, 1), lambda i: (0, 0)),
            pl.BlockSpec((9, c2, c1), lambda i: (0, 0, 0)),
            pl.BlockSpec((c2, 1), lambda i: (0, 0)),
        ],
        out_specs=pl.BlockSpec((1, c2, mc), lambda i: (i, 0, 0)),
        scratch_shapes=[pltpu.VMEM((c1, m1), jnp.float32)],
        compiler_params=pltpu.CompilerParams(dimension_semantics=("parallel",)),
    )(xf, mask, w1, b1, w2, b2)
    # strip the canvas border (boundary plumbing only; already NCHW)
    return out.reshape(n, c2, h + 2, wc)[:, :, 1:h + 1, 1:w + 1]


def fused_pose_net(pairs_nchw, kp):
    """(N, 6, H, W) raw channel-concatenated pairs -> (N, 6, 1) scaled pose."""
    n, c, h, w = pairs_nchw.shape
    wc = w + 2
    mc = (h + 2) * wc
    e = wc + 1
    xf = _flatten_canvas(pairs_nchw, e)              # (N, 6, Mc + 2e)
    mask = _interior_mask(h, w, 0)                   # (1, Mc)
    w1, b1, wfc, bfc = kp["pw1"], kp["pb1"], kp["pwfc"], kp["pbfc"]
    c1 = w1.shape[1]
    return pl.pallas_call(
        functools.partial(_fused_pose_kernel, row_stride=wc,
                          inv_hw=1.0 / float(h * w)),
        out_shape=jax.ShapeDtypeStruct((n, 6, 1), jnp.float32),
        grid=(n,),
        in_specs=[
            pl.BlockSpec((1, c, mc + 2 * e), lambda i: (i, 0, 0)),
            pl.BlockSpec((1, mc), lambda i: (0, 0)),
            pl.BlockSpec((9, c1, c), lambda i: (0, 0, 0)),
            pl.BlockSpec((c1, 1), lambda i: (0, 0)),
            pl.BlockSpec((6, c1), lambda i: (0, 0)),
            pl.BlockSpec((6, 1), lambda i: (0, 0)),
        ],
        out_specs=pl.BlockSpec((1, 6, 1), lambda i: (i, 0, 0)),
        compiler_params=pltpu.CompilerParams(dimension_semantics=("parallel",)),
    )(xf, mask, w1, b1, wfc, bfc)


# ---------------------------------------------------------------------------
# Parameters (synthetic depth_net / pose_encoder, torch-style layout)
# ---------------------------------------------------------------------------
def init_params(key):
    k = jax.random.split(key, 4)
    return {
        # depth_net: conv3x3(3->8)+relu, conv3x3(8->2)+sigmoid (2 "scales")
        "depth_w1": 0.1 * jax.random.normal(k[0], (8, 3, 3, 3), jnp.float32),
        "depth_b1": jnp.zeros((8,), jnp.float32),
        "depth_w2": 0.1 * jax.random.normal(k[1], (2, 8, 3, 3), jnp.float32),
        "depth_b2": jnp.zeros((2,), jnp.float32),
        # pose_encoder(6, input_chans=6): conv3x3(6->8)+relu, GAP, fc(8->6)
        "pose_w1": 0.1 * jax.random.normal(k[2], (8, 6, 3, 3), jnp.float32),
        "pose_b1": jnp.zeros((8,), jnp.float32),
        "pose_wfc": 0.1 * jax.random.normal(k[3], (8, 6), jnp.float32),
        "pose_bfc": jnp.zeros((6,), jnp.float32),
    }


def prepare_kernel_params(p):
    """Fold normalization into conv1, pose scaling into the fc, and reshape
    conv weights into per-tap (9, Cout, Cin) matrices (tap index kh*3+kw)."""
    a = 1.0 / 0.225
    c = 0.45 / 0.225

    def tap_mats(w):            # (Cout, Cin, 3, 3) -> (9, Cout, Cin)
        return jnp.transpose(w, (2, 3, 0, 1)).reshape(9, w.shape[0], w.shape[1])

    return {
        "dw1": tap_mats(p["depth_w1"] * a),
        "db1": (p["depth_b1"] - c * p["depth_w1"].sum(axis=(1, 2, 3)))[:, None],
        "dw2": tap_mats(p["depth_w2"]),
        "db2": p["depth_b2"][:, None],
        "pw1": tap_mats(p["pose_w1"] * a),
        "pb1": (p["pose_b1"] - c * p["pose_w1"].sum(axis=(1, 2, 3)))[:, None],
        "pwfc": (p["pose_wfc"] * POSE_SCALE[None, :]).T,
        "pbfc": (p["pose_bfc"] * POSE_SCALE)[:, None],
    }


# ---------------------------------------------------------------------------
# MonoDepthPair forward
# ---------------------------------------------------------------------------
def mono_depth_pair_forward(cur_image, refers_images, kp):
    """cur_image: (B,3,H,W); refers_images: list of (B,3,H,W).  NCHW API."""
    b = cur_image.shape[0]
    r = len(refers_images)

    # depth: one fused launch for cur + all reference images (stays NCHW)
    d_all = fused_depth_net(
        jnp.concatenate([cur_image] + list(refers_images), axis=0), kp)
    depth_maps = lambda d: [d[:, 1:2], d[:, 0:1]]        # depth_net(...)[::-1]
    cur_depth_map = depth_maps(d_all[:b])
    refers_depth_maps = [depth_maps(d_all[(i + 1) * b:(i + 2) * b])
                         for i in range(r)]

    # pose: one fused launch for all 2*R (cur,x)/(x,cur) pairs
    pairs = []
    for x in refers_images:
        pairs.append(jnp.concatenate([cur_image, x], axis=1))  # get_pose(cur,x)
        pairs.append(jnp.concatenate([x, cur_image], axis=1))  # get_pose(x,cur)
    p_all = fused_pose_net(jnp.concatenate(pairs, axis=0), kp)   # (2R*B, 6, 1)
    p_all = p_all.reshape(2 * r, b, 6)[:, :, None, :]            # (2R, B, 1, 6)
    pose = [p_all[2 * i] for i in range(r)]
    pose_inv = [p_all[2 * i + 1] for i in range(r)]
    return cur_depth_map, refers_depth_maps, pose, pose_inv


# ---------------------------------------------------------------------------
# Pure-JAX reference (unfused, NCHW) for validation
# ---------------------------------------------------------------------------
def _conv3x3_ref(x, w, bias):
    y = jax.lax.conv_general_dilated(
        x, w, (1, 1), "SAME", dimension_numbers=("NCHW", "OIHW", "NCHW"),
        precision=jax.lax.Precision.HIGHEST)
    return y + bias[None, :, None, None]


def ref_forward(cur, refs, p):
    norm = lambda t: (t - 0.45) / 0.225

    def depth_maps(x):
        h = jnp.maximum(_conv3x3_ref(x, p["depth_w1"], p["depth_b1"]), 0.0)
        d = jax.nn.sigmoid(_conv3x3_ref(h, p["depth_w2"], p["depth_b2"]))
        return [d[:, 1:2], d[:, 0:1]]

    def get_pose(a, b):
        x = jnp.concatenate([a, b], axis=1)
        h = jnp.maximum(_conv3x3_ref(x, p["pose_w1"], p["pose_b1"]), 0.0)
        g = h.mean(axis=(2, 3))
        y = 0.1 * (jnp.dot(g, p["pose_wfc"],
                           precision=jax.lax.Precision.HIGHEST)
                   + p["pose_bfc"]).reshape(a.shape[0], -1, 6)
        y = y.at[..., -1].multiply(0.5)
        y = y.at[..., :3].multiply(0.1)
        return y

    cur_x = norm(cur)
    refs_x = [norm(t) for t in refs]
    cur_d = depth_maps(cur_x)
    pose, pose_inv, refs_d = [], [], []
    for x in refs_x:
        pose.append(get_pose(cur_x, x))
        pose_inv.append(get_pose(x, cur_x))
        refs_d.append(depth_maps(x))
    return cur_d, refs_d, pose, pose_inv


# ---------------------------------------------------------------------------
if __name__ == "__main__":
    key = jax.random.PRNGKey(0)
    kparam_key, k1, k2, k3 = jax.random.split(key, 4)
    params = init_params(kparam_key)
    kparams = prepare_kernel_params(params)

    B, C, H, W = 2, 3, 16, 16
    cur_image = jax.random.uniform(k1, (B, C, H, W), jnp.float32)
    refers_images = [
        jax.random.uniform(k2, (B, C, H, W), jnp.float32),
        jax.random.uniform(k3, (B, C, H, W), jnp.float32),
    ]

    fwd = jax.jit(mono_depth_pair_forward)
    out = fwd(cur_image, refers_images, kparams)
    out = jax.block_until_ready(out)
    cur_depth, refers_depth, pose, pose_inv = out

    assert len(cur_depth) == 2 and cur_depth[0].shape == (B, 1, H, W)
    assert len(refers_depth) == 2 and refers_depth[0][0].shape == (B, 1, H, W)
    assert len(pose) == 2 and pose[0].shape == (B, 1, 6)
    assert len(pose_inv) == 2 and pose_inv[0].shape == (B, 1, 6)
    assert all(bool(jnp.all(jnp.isfinite(t))) for t in jax.tree.leaves(out))

    ref = ref_forward(cur_image, refers_images, params)
    for got, want in zip(jax.tree.leaves(out), jax.tree.leaves(ref)):
        assert got.shape == want.shape, (got.shape, want.shape)
        assert bool(jnp.allclose(got, want, rtol=1e-2, atol=1e-3)), \
            float(jnp.max(jnp.abs(got - want)))

    print("KERNEL_OK")
</pallas_src>

<mosaic_0001>
module attributes {stable_mosaic.version = 11 : i64} {
  func.func @_fused_depth_kernel(%arg0: i32, %arg1: memref<1x3x400xf32, #tpu.memory_space<vmem>>, %arg2: memref<1x362xf32, #tpu.memory_space<vmem>>, %arg3: memref<9x8x3xf32, #tpu.memory_space<vmem>>, %arg4: memref<8x1xf32, #tpu.memory_space<vmem>>, %arg5: memref<9x2x8xf32, #tpu.memory_space<vmem>>, %arg6: memref<2x1xf32, #tpu.memory_space<vmem>>, %arg7: memref<1x2x324xf32, #tpu.memory_space<vmem>>, %arg8: memref<8x362xf32, #tpu.memory_space<vmem>>) attributes {dimension_semantics = [#tpu.dimension_semantics<parallel>], iteration_bounds = array<i64: 6>, scalar_prefetch = 0 : i64, scratch_operands = 1 : i64, tpu.core_type = #tpu.core_type<tc>, window_params = [{transform_indices = @transform_0, window_bounds = array<i64: 1, 3, 400>}, {pipeline_mode = #tpu.pipeline_mode<synchronous>, transform_indices = @transform_1, window_bounds = array<i64: 1, 362>}, {pipeline_mode = #tpu.pipeline_mode<synchronous>, transform_indices = @transform_2, window_bounds = array<i64: 9, 8, 3>}, {pipeline_mode = #tpu.pipeline_mode<synchronous>, transform_indices = @transform_3, window_bounds = array<i64: 8, 1>}, {pipeline_mode = #tpu.pipeline_mode<synchronous>, transform_indices = @transform_4, window_bounds = array<i64: 9, 2, 8>}, {pipeline_mode = #tpu.pipeline_mode<synchronous>, transform_indices = @transform_5, window_bounds = array<i64: 2, 1>}, {transform_indices = @transform_6, window_bounds = array<i64: 1, 2, 324>}]} {
    %cst = arith.constant 0.000000e+00 : f32
    %0 = vector.broadcast %cst : f32 to vector<8x362xf32>
    %c0 = arith.constant 0 : index
    %c0_0 = arith.constant 0 : index
    %c0_1 = arith.constant 0 : index
    %1 = vector.load %arg1[%c0, %c0_0, %c0_1] : memref<1x3x400xf32, #tpu.memory_space<vmem>>, vector<1x3x362xf32>
    %2 = vector.shape_cast %1 : vector<1x3x362xf32> to vector<3x362xf32>
    %c0_2 = arith.constant 0 : index
    %c0_3 = arith.constant 0 : index
    %c0_4 = arith.constant 0 : index
    %3 = vector.load %arg3[%c0_2, %c0_3, %c0_4] : memref<9x8x3xf32, #tpu.memory_space<vmem>>, vector<1x8x3xf32>
    %4 = vector.shape_cast %3 : vector<1x8x3xf32> to vector<8x3xf32>
    %cst_5 = arith.constant dense<0.000000e+00> : vector<8x362xf32>
    %5 = tpu.matmul %4, %2, %cst_5 {dimension_numbers = #tpu.dot_dimension_numbers<[1], [0], [0], [1], [0, 0, 1, 1], [], []>} : vector<8x3xf32>, vector<3x362xf32>, vector<8x362xf32> -> vector<8x362xf32>
    %6 = arith.addf %0, %5 : vector<8x362xf32>
    %c0_6 = arith.constant 0 : index
    %c0_7 = arith.constant 0 : index
    %c1 = arith.constant 1 : index
    %7 = vector.load %arg1[%c0_6, %c0_7, %c1] : memref<1x3x400xf32, #tpu.memory_space<vmem>>, vector<1x3x362xf32>
    %8 = vector.shape_cast %7 : vector<1x3x362xf32> to vector<3x362xf32>
    %c1_8 = arith.constant 1 : index
    %c0_9 = arith.constant 0 : index
    %c0_10 = arith.constant 0 : index
    %9 = vector.load %arg3[%c1_8, %c0_9, %c0_10] : memref<9x8x3xf32, #tpu.memory_space<vmem>>, vector<1x8x3xf32>
    %10 = vector.shape_cast %9 : vector<1x8x3xf32> to vector<8x3xf32>
    %cst_11 = arith.constant dense<0.000000e+00> : vector<8x362xf32>
    %11 = tpu.matmul %10, %8, %cst_11 {dimension_numbers = #tpu.dot_dimension_numbers<[1], [0], [0], [1], [0, 0, 1, 1], [], []>} : vector<8x3xf32>, vector<3x362xf32>, vector<8x362xf32> -> vector<8x362xf32>
    %12 = arith.addf %6, %11 : vector<8x362xf32>
    %c0_12 = arith.constant 0 : index
    %c0_13 = arith.constant 0 : index
    %c2 = arith.constant 2 : index
    %13 = vector.load %arg1[%c0_12, %c0_13, %c2] : memref<1x3x400xf32, #tpu.memory_space<vmem>>, vector<1x3x362xf32>
    %14 = vector.shape_cast %13 : vector<1x3x362xf32> to vector<3x362xf32>
    %c2_14 = arith.constant 2 : index
    %c0_15 = arith.constant 0 : index
    %c0_16 = arith.constant 0 : index
    %15 = vector.load %arg3[%c2_14, %c0_15, %c0_16] : memref<9x8x3xf32, #tpu.memory_space<vmem>>, vector<1x8x3xf32>
    %16 = vector.shape_cast %15 : vector<1x8x3xf32> to vector<8x3xf32>
    %cst_17 = arith.constant dense<0.000000e+00> : vector<8x362xf32>
    %17 = tpu.matmul %16, %14, %cst_17 {dimension_numbers = #tpu.dot_dimension_numbers<[1], [0], [0], [1], [0, 0, 1, 1], [], []>} : vector<8x3xf32>, vector<3x362xf32>, vector<8x362xf32> -> vector<8x362xf32>
    %18 = arith.addf %12, %17 : vector<8x362xf32>
    %c0_18 = arith.constant 0 : index
    %c0_19 = arith.constant 0 : index
    %c18 = arith.constant 18 : index
    %19 = vector.load %arg1[%c0_18, %c0_19, %c18] : memref<1x3x400xf32, #tpu.memory_space<vmem>>, vector<1x3x362xf32>
    %20 = vector.shape_cast %19 : vector<1x3x362xf32> to vector<3x362xf32>
    %c3 = arith.constant 3 : index
    %c0_20 = arith.constant 0 : index
    %c0_21 = arith.constant 0 : index
    %21 = vector.load %arg3[%c3, %c0_20, %c0_21] : memref<9x8x3xf32, #tpu.memory_space<vmem>>, vector<1x8x3xf32>
    %22 = vector.shape_cast %21 : vector<1x8x3xf32> to vector<8x3xf32>
    %cst_22 = arith.constant dense<0.000000e+00> : vector<8x362xf32>
    %23 = tpu.matmul %22, %20, %cst_22 {dimension_numbers = #tpu.dot_dimension_numbers<[1], [0], [0], [1], [0, 0, 1, 1], [], []>} : vector<8x3xf32>, vector<3x362xf32>, vector<8x362xf32> -> vector<8x362xf32>
    %24 = arith.addf %18, %23 : vector<8x362xf32>
    %c0_23 = arith.constant 0 : index
    %c0_24 = arith.constant 0 : index
    %c19 = arith.constant 19 : index
    %25 = vector.load %arg1[%c0_23, %c0_24, %c19] : memref<1x3x400xf32, #tpu.memory_space<vmem>>, vector<1x3x362xf32>
    %26 = vector.shape_cast %25 : vector<1x3x362xf32> to vector<3x362xf32>
    %c4 = arith.constant 4 : index
    %c0_25 = arith.constant 0 : index
    %c0_26 = arith.constant 0 : index
    %27 = vector.load %arg3[%c4, %c0_25, %c0_26] : memref<9x8x3xf32, #tpu.memory_space<vmem>>, vector<1x8x3xf32>
    %28 = vector.shape_cast %27 : vector<1x8x3xf32> to vector<8x3xf32>
    %cst_27 = arith.constant dense<0.000000e+00> : vector<8x362xf32>
    %29 = tpu.matmul %28, %26, %cst_27 {dimension_numbers = #tpu.dot_dimension_numbers<[1], [0], [0], [1], [0, 0, 1, 1], [], []>} : vector<8x3xf32>, vector<3x362xf32>, vector<8x362xf32> -> vector<8x362xf32>
    %30 = arith.addf %24, %29 : vector<8x362xf32>
    %c0_28 = arith.constant 0 : index
    %c0_29 = arith.constant 0 : index
    %c20 = arith.constant 20 : index
    %31 = vector.load %arg1[%c0_28, %c0_29, %c20] : memref<1x3x400xf32, #tpu.memory_space<vmem>>, vector<1x3x362xf32>
    %32 = vector.shape_cast %31 : vector<1x3x362xf32> to vector<3x362xf32>
    %c5 = arith.constant 5 : index
    %c0_30 = arith.constant 0 : index
    %c0_31 = arith.constant 0 : index
    %33 = vector.load %arg3[%c5, %c0_30, %c0_31] : memref<9x8x3xf32, #tpu.memory_space<vmem>>, vector<1x8x3xf32>
    %34 = vector.shape_cast %33 : vector<1x8x3xf32> to vector<8x3xf32>
    %cst_32 = arith.constant dense<0.000000e+00> : vector<8x362xf32>
    %35 = tpu.matmul %34, %32, %cst_32 {dimension_numbers = #tpu.dot_dimension_numbers<[1], [0], [0], [1], [0, 0, 1, 1], [], []>} : vector<8x3xf32>, vector<3x362xf32>, vector<8x362xf32> -> vector<8x362xf32>
    %36 = arith.addf %30, %35 : vector<8x362xf32>
    %c0_33 = arith.constant 0 : index
    %c0_34 = arith.constant 0 : index
    %c36 = arith.constant 36 : index
    %37 = vector.load %arg1[%c0_33, %c0_34, %c36] : memref<1x3x400xf32, #tpu.memory_space<vmem>>, vector<1x3x362xf32>
    %38 = vector.shape_cast %37 : vector<1x3x362xf32> to vector<3x362xf32>
    %c6 = arith.constant 6 : index
    %c0_35 = arith.constant 0 : index
    %c0_36 = arith.constant 0 : index
    %39 = vector.load %arg3[%c6, %c0_35, %c0_36] : memref<9x8x3xf32, #tpu.memory_space<vmem>>, vector<1x8x3xf32>
    %40 = vector.shape_cast %39 : vector<1x8x3xf32> to vector<8x3xf32>
    %cst_37 = arith.constant dense<0.000000e+00> : vector<8x362xf32>
    %41 = tpu.matmul %40, %38, %cst_37 {dimension_numbers = #tpu.dot_dimension_numbers<[1], [0], [0], [1], [0, 0, 1, 1], [], []>} : vector<8x3xf32>, vector<3x362xf32>, vector<8x362xf32> -> vector<8x362xf32>
    %42 = arith.addf %36, %41 : vector<8x362xf32>
    %c0_38 = arith.constant 0 : index
    %c0_39 = arith.constant 0 : index
    %c37 = arith.constant 37 : index
    %43 = vector.load %arg1[%c0_38, %c0_39, %c37] : memref<1x3x400xf32, #tpu.memory_space<vmem>>, vector<1x3x362xf32>
    %44 = vector.shape_cast %43 : vector<1x3x362xf32> to vector<3x362xf32>
    %c7 = arith.constant 7 : index
    %c0_40 = arith.constant 0 : index
    %c0_41 = arith.constant 0 : index
    %45 = vector.load %arg3[%c7, %c0_40, %c0_41] : memref<9x8x3xf32, #tpu.memory_space<vmem>>, vector<1x8x3xf32>
    %46 = vector.shape_cast %45 : vector<1x8x3xf32> to vector<8x3xf32>
    %cst_42 = arith.constant dense<0.000000e+00> : vector<8x362xf32>
    %47 = tpu.matmul %46, %44, %cst_42 {dimension_numbers = #tpu.dot_dimension_numbers<[1], [0], [0], [1], [0, 0, 1, 1], [], []>} : vector<8x3xf32>, vector<3x362xf32>, vector<8x362xf32> -> vector<8x362xf32>
    %48 = arith.addf %42, %47 : vector<8x362xf32>
    %c0_43 = arith.constant 0 : index
    %c0_44 = arith.constant 0 : index
    %c38 = arith.constant 38 : index
    %49 = vector.load %arg1[%c0_43, %c0_44, %c38] : memref<1x3x400xf32, #tpu.memory_space<vmem>>, vector<1x3x362xf32>
    %50 = vector.shape_cast %49 : vector<1x3x362xf32> to vector<3x362xf32>
    %c8 = arith.constant 8 : index
    %c0_45 = arith.constant 0 : index
    %c0_46 = arith.constant 0 : index
    %51 = vector.load %arg3[%c8, %c0_45, %c0_46] : memref<9x8x3xf32, #tpu.memory_space<vmem>>, vector<1x8x3xf32>
    %52 = vector.shape_cast %51 : vector<1x8x3xf32> to vector<8x3xf32>
    %cst_47 = arith.constant dense<0.000000e+00> : vector<8x362xf32>
    %53 = tpu.matmul %52, %50, %cst_47 {dimension_numbers = #tpu.dot_dimension_numbers<[1], [0], [0], [1], [0, 0, 1, 1], [], []>} : vector<8x3xf32>, vector<3x362xf32>, vector<8x362xf32> -> vector<8x362xf32>
    %54 = arith.addf %48, %53 : vector<8x362xf32>
    %c0_48 = arith.constant 0 : index
    %c0_49 = arith.constant 0 : index
    %55 = vector.load %arg4[%c0_48, %c0_49] : memref<8x1xf32, #tpu.memory_space<vmem>>, vector<8x1xf32>
    %56 = vector.broadcast %55 : vector<8x1xf32> to vector<8x362xf32>
    %57 = arith.addf %54, %56 : vector<8x362xf32>
    %cst_50 = arith.constant 0.000000e+00 : f32
    %58 = vector.broadcast %cst_50 : f32 to vector<8x362xf32>
    %59 = arith.maximumf %57, %58 : vector<8x362xf32>
    %c0_51 = arith.constant 0 : index
    %c0_52 = arith.constant 0 : index
    %60 = vector.load %arg2[%c0_51, %c0_52] : memref<1x362xf32, #tpu.memory_space<vmem>>, vector<1x362xf32>
    %61 = vector.broadcast %60 : vector<1x362xf32> to vector<8x362xf32>
    %62 = arith.mulf %59, %61 : vector<8x362xf32>
    %c0_53 = arith.constant 0 : index
    %c0_54 = arith.constant 0 : index
    %63 = vector.load %arg8[%c0_53, %c0_54] : memref<8x362xf32, #tpu.memory_space<vmem>>, vector<8x362xf32>
    tpu.vector_store %arg8[%c0_53, %c0_54], %62 {strides = array<i32>} : memref<8x362xf32, #tpu.memory_space<vmem>>, vector<8x362xf32>,
    %cst_55 = arith.constant 0.000000e+00 : f32
    %64 = vector.broadcast %cst_55 : f32 to vector<2x324xf32>
    %c0_56 = arith.constant 0 : index
    %c0_57 = arith.constant 0 : index
    %65 = vector.load %arg8[%c0_56, %c0_57] : memref<8x362xf32, #tpu.memory_space<vmem>>, vector<8x324xf32>
    %c0_58 = arith.constant 0 : index
    %c0_59 = arith.constant 0 : index
    %c0_60 = arith.constant 0 : index
    %66 = vector.load %arg5[%c0_58, %c0_59, %c0_60] : memref<9x2x8xf32, #tpu.memory_space<vmem>>, vector<1x2x8xf32>
    %67 = vector.shape_cast %66 : vector<1x2x8xf32> to vector<2x8xf32>
    %cst_61 = arith.constant dense<0.000000e+00> : vector<2x324xf32>
    %68 = tpu.matmul %67, %65, %cst_61 {dimension_numbers = #tpu.dot_dimension_numbers<[1], [0], [0], [1], [0, 0, 1, 1], [], []>} : vector<2x8xf32>, vector<8x324xf32>, vector<2x324xf32> -> vector<2x324xf32>
    %69 = arith.addf %64, %68 : vector<2x324xf32>
    %c0_62 = arith.constant 0 : index
    %c1_63 = arith.constant 1 : index
    %70 = vector.load %arg8[%c0_62, %c1_63] : memref<8x362xf32, #tpu.memory_space<vmem>>, vector<8x324xf32>
    %c1_64 = arith.constant 1 : index
    %c0_65 = arith.constant 0 : index
    %c0_66 = arith.constant 0 : index
    %71 = vector.load %arg5[%c1_64, %c0_65, %c0_66] : memref<9x2x8xf32, #tpu.memory_space<vmem>>, vector<1x2x8xf32>
    %72 = vector.shape_cast %71 : vector<1x2x8xf32> to vector<2x8xf32>
    %cst_67 = arith.constant dense<0.000000e+00> : vector<2x324xf32>
    %73 = tpu.matmul %72, %70, %cst_67 {dimension_numbers = #tpu.dot_dimension_numbers<[1], [0], [0], [1], [0, 0, 1, 1], [], []>} : vector<2x8xf32>, vector<8x324xf32>, vector<2x324xf32> -> vector<2x324xf32>
    %74 = arith.addf %69, %73 : vector<2x324xf32>
    %c0_68 = arith.constant 0 : index
    %c2_69 = arith.constant 2 : index
    %75 = vector.load %arg8[%c0_68, %c2_69] : memref<8x362xf32, #tpu.memory_space<vmem>>, vector<8x324xf32>
    %c2_70 = arith.constant 2 : index
    %c0_71 = arith.constant 0 : index
    %c0_72 = arith.constant 0 : index
    %76 = vector.load %arg5[%c2_70, %c0_71, %c0_72] : memref<9x2x8xf32, #tpu.memory_space<vmem>>, vector<1x2x8xf32>
    %77 = vector.shape_cast %76 : vector<1x2x8xf32> to vector<2x8xf32>
    %cst_73 = arith.constant dense<0.000000e+00> : vector<2x324xf32>
    %78 = tpu.matmul %77, %75, %cst_73 {dimension_numbers = #tpu.dot_dimension_numbers<[1], [0], [0], [1], [0, 0, 1, 1], [], []>} : vector<2x8xf32>, vector<8x324xf32>, vector<2x324xf32> -> vector<2x324xf32>
    %79 = arith.addf %74, %78 : vector<2x324xf32>
    %c0_74 = arith.constant 0 : index
    %c18_75 = arith.constant 18 : index
    %80 = vector.load %arg8[%c0_74, %c18_75] : memref<8x362xf32, #tpu.memory_space<vmem>>, vector<8x324xf32>
    %c3_76 = arith.constant 3 : index
    %c0_77 = arith.constant 0 : index
    %c0_78 = arith.constant 0 : index
    %81 = vector.load %arg5[%c3_76, %c0_77, %c0_78] : memref<9x2x8xf32, #tpu.memory_space<vmem>>, vector<1x2x8xf32>
    %82 = vector.shape_cast %81 : vector<1x2x8xf32> to vector<2x8xf32>
    %cst_79 = arith.constant dense<0.000000e+00> : vector<2x324xf32>
    %83 = tpu.matmul %82, %80, %cst_79 {dimension_numbers = #tpu.dot_dimension_numbers<[1], [0], [0], [1], [0, 0, 1, 1], [], []>} : vector<2x8xf32>, vector<8x324xf32>, vector<2x324xf32> -> vector<2x324xf32>
    %84 = arith.addf %79, %83 : vector<2x324xf32>
    %c0_80 = arith.constant 0 : index
    %c19_81 = arith.constant 19 : index
    %85 = vector.load %arg8[%c0_80, %c19_81] : memref<8x362xf32, #tpu.memory_space<vmem>>, vector<8x324xf32>
    %c4_82 = arith.constant 4 : index
    %c0_83 = arith.constant 0 : index
    %c0_84 = arith.constant 0 : index
    %86 = vector.load %arg5[%c4_82, %c0_83, %c0_84] : memref<9x2x8xf32, #tpu.memory_space<vmem>>, vector<1x2x8xf32>
    %87 = vector.shape_cast %86 : vector<1x2x8xf32> to vector<2x8xf32>
    %cst_85 = arith.constant dense<0.000000e+00> : vector<2x324xf32>
    %88 = tpu.matmul %87, %85, %cst_85 {dimension_numbers = #tpu.dot_dimension_numbers<[1], [0], [0], [1], [0, 0, 1, 1], [], []>} : vector<2x8xf32>, vector<8x324xf32>, vector<2x324xf32> -> vector<2x324xf32>
    %89 = arith.addf %84, %88 : vector<2x324xf32>
    %c0_86 = arith.constant 0 : index
    %c20_87 = arith.constant 20 : index
    %90 = vector.load %arg8[%c0_86, %c20_87] : memref<8x362xf32, #tpu.memory_space<vmem>>, vector<8x324xf32>
    %c5_88 = arith.constant 5 : index
    %c0_89 = arith.constant 0 : index
    %c0_90 = arith.constant 0 : index
    %91 = vector.load %arg5[%c5_88, %c0_89, %c0_90] : memref<9x2x8xf32, #tpu.memory_space<vmem>>, vector<1x2x8xf32>
    %92 = vector.shape_cast %91 : vector<1x2x8xf32> to vector<2x8xf32>
    %cst_91 = arith.constant dense<0.000000e+00> : vector<2x324xf32>
    %93 = tpu.matmul %92, %90, %cst_91 {dimension_numbers = #tpu.dot_dimension_numbers<[1], [0], [0], [1], [0, 0, 1, 1], [], []>} : vector<2x8xf32>, vector<8x324xf32>, vector<2x324xf32> -> vector<2x324xf32>
    %94 = arith.addf %89, %93 : vector<2x324xf32>
    %c0_92 = arith.constant 0 : index
    %c36_93 = arith.constant 36 : index
    %95 = vector.load %arg8[%c0_92, %c36_93] : memref<8x362xf32, #tpu.memory_space<vmem>>, vector<8x324xf32>
    %c6_94 = arith.constant 6 : index
    %c0_95 = arith.constant 0 : index
    %c0_96 = arith.constant 0 : index
    %96 = vector.load %arg5[%c6_94, %c0_95, %c0_96] : memref<9x2x8xf32, #tpu.memory_space<vmem>>, vector<1x2x8xf32>
    %97 = vector.shape_cast %96 : vector<1x2x8xf32> to vector<2x8xf32>
    %cst_97 = arith.constant dense<0.000000e+00> : vector<2x324xf32>
    %98 = tpu.matmul %97, %95, %cst_97 {dimension_numbers = #tpu.dot_dimension_numbers<[1], [0], [0], [1], [0, 0, 1, 1], [], []>} : vector<2x8xf32>, vector<8x324xf32>, vector<2x324xf32> -> vector<2x324xf32>
    %99 = arith.addf %94, %98 : vector<2x324xf32>
    %c0_98 = arith.constant 0 : index
    %c37_99 = arith.constant 37 : index
    %100 = vector.load %arg8[%c0_98, %c37_99] : memref<8x362xf32, #tpu.memory_space<vmem>>, vector<8x324xf32>
    %c7_100 = arith.constant 7 : index
    %c0_101 = arith.constant 0 : index
    %c0_102 = arith.constant 0 : index
    %101 = vector.load %arg5[%c7_100, %c0_101, %c0_102] : memref<9x2x8xf32, #tpu.memory_space<vmem>>, vector<1x2x8xf32>
    %102 = vector.shape_cast %101 : vector<1x2x8xf32> to vector<2x8xf32>
    %cst_103 = arith.constant dense<0.000000e+00> : vector<2x324xf32>
    %103 = tpu.matmul %102, %100, %cst_103 {dimension_numbers = #tpu.dot_dimension_numbers<[1], [0], [0], [1], [0, 0, 1, 1], [], []>} : vector<2x8xf32>, vector<8x324xf32>, vector<2x324xf32> -> vector<2x324xf32>
    %104 = arith.addf %99, %103 : vector<2x324xf32>
    %c0_104 = arith.constant 0 : index
    %c38_105 = arith.constant 38 : index
    %105 = vector.load %arg8[%c0_104, %c38_105] : memref<8x362xf32, #tpu.memory_space<vmem>>, vector<8x324xf32>
    %c8_106 = arith.constant 8 : index
    %c0_107 = arith.constant 0 : index
    %c0_108 = arith.constant 0 : index
    %106 = vector.load %arg5[%c8_106, %c0_107, %c0_108] : memref<9x2x8xf32, #tpu.memory_space<vmem>>, vector<1x2x8xf32>
    %107 = vector.shape_cast %106 : vector<1x2x8xf32> to vector<2x8xf32>
    %cst_109 = arith.constant dense<0.000000e+00> : vector<2x324xf32>
    %108 = tpu.matmul %107, %105, %cst_109 {dimension_numbers = #tpu.dot_dimension_numbers<[1], [0], [0], [1], [0, 0, 1, 1], [], []>} : vector<2x8xf32>, vector<8x324xf32>, vector<2x324xf32> -> vector<2x324xf32>
    %109 = arith.addf %104, %108 : vector<2x324xf32>
    %c0_110 = arith.constant 0 : index
    %c0_111 = arith.constant 0 : index
    %110 = vector.load %arg6[%c0_110, %c0_111] : memref<2x1xf32, #tpu.memory_space<vmem>>, vector<2x1xf32>
    %111 = vector.broadcast %110 : vector<2x1xf32> to vector<2x324xf32>
    %112 = arith.addf %109, %111 : vector<2x324xf32>
    %113 = arith.negf %112 : vector<2x324xf32>
    %114 = math.exp %113 : vector<2x324xf32>
    %cst_112 = arith.constant 1.000000e+00 : f32
    %115 = vector.broadcast %cst_112 : f32 to vector<2x324xf32>
    %116 = arith.addf %115, %114 : vector<2x324xf32>
    %117 = arith.divf %115, %116 : vector<2x324xf32>
    %c0_113 = arith.constant 0 : index
    %c0_114 = arith.constant 0 : index
    %c0_115 = arith.constant 0 : index
    %118 = vector.load %arg7[%c0_113, %c0_114, %c0_115] : memref<1x2x324xf32, #tpu.memory_space<vmem>>, vector<1x2x324xf32>
    %119 = vector.shape_cast %118 : vector<1x2x324xf32> to vector<2x324xf32>
    %120 = vector.shape_cast %117 : vector<2x324xf32> to vector<1x2x324xf32>
    tpu.vector_store %arg7[%c0_113, %c0_114, %c0_115], %120 {strides = array<i32>} : memref<1x2x324xf32, #tpu.memory_space<vmem>>, vector<1x2x324xf32>,
    return
  }
  func.func @transform_0(%arg0: i32) -> (i32, i32, i32) {
    %c0_i32 = arith.constant 0 : i32
    %c0_i32_0 = arith.constant 0 : i32
    %c0_i32_1 = arith.constant 0 : i32
    return %arg0, %c0_i32, %c0_i32_0 : i32, i32, i32
  }
  func.func @transform_1(%arg0: i32) -> (i32, i32) {
    %c0_i32 = arith.constant 0 : i32
    %c0_i32_0 = arith.constant 0 : i32
    %c0_i32_1 = arith.constant 0 : i32
    return %c0_i32, %c0_i32_0 : i32, i32
  }
  func.func @transform_2(%arg0: i32) -> (i32, i32, i32) {
    %c0_i32 = arith.constant 0 : i32
    %c0_i32_0 = arith.constant 0 : i32
    %c0_i32_1 = arith.constant 0 : i32
    %c0_i32_2 = arith.constant 0 : i32
    return %c0_i32, %c0_i32_0, %c0_i32_1 : i32, i32, i32
  }
  func.func @transform_3(%arg0: i32) -> (i32, i32) {
    %c0_i32 = arith.constant 0 : i32
    %c0_i32_0 = arith.constant 0 : i32
    %c0_i32_1 = arith.constant 0 : i32
    return %c0_i32, %c0_i32_0 : i32, i32
  }
  func.func @transform_4(%arg0: i32) -> (i32, i32, i32) {
    %c0_i32 = arith.constant 0 : i32
    %c0_i32_0 = arith.constant 0 : i32
    %c0_i32_1 = arith.constant 0 : i32
    %c0_i32_2 = arith.constant 0 : i32
    return %c0_i32, %c0_i32_0, %c0_i32_1 : i32, i32, i32
  }
  func.func @transform_5(%arg0: i32) -> (i32, i32) {
    %c0_i32 = arith.constant 0 : i32
    %c0_i32_0 = arith.constant 0 : i32
    %c0_i32_1 = arith.constant 0 : i32
    return %c0_i32, %c0_i32_0 : i32, i32
  }
  func.func @transform_6(%arg0: i32) -> (i32, i32, i32) {
    %c0_i32 = arith.constant 0 : i32
    %c0_i32_0 = arith.constant 0 : i32
    %c0_i32_1 = arith.constant 0 : i32
    return %arg0, %c0_i32, %c0_i32_0 : i32, i32, i32
  }
}

module attributes {stable_mosaic.version = 11 : i64} {
  func.func @_fused_pose_kernel(%arg0: i32, %arg1: memref<1x6x362xf32, #tpu.memory_space<vmem>>, %arg2: memref<1x324xf32, #tpu.memory_space<vmem>>, %arg3: memref<9x8x6xf32, #tpu.memory_space<vmem>>, %arg4: memref<8x1xf32, #tpu.memory_space<vmem>>, %arg5: memref<6x8xf32, #tpu.memory_space<vmem>>, %arg6: memref<6x1xf32, #tpu.memory_space<vmem>>, %arg7: memref<1x6x1xf32, #tpu.memory_space<vmem>>) attributes {dimension_semantics = [#tpu.dimension_semantics<parallel>], iteration_bounds = array<i64: 8>, scalar_prefetch = 0 : i64, scratch_operands = 0 : i64, tpu.core_type = #tpu.core_type<tc>, window_params = [{transform_indices = @transform_0, window_bounds = array<i64: 1, 6, 362>}, {pipeline_mode = #tpu.pipeline_mode<synchronous>, transform_indices = @transform_1, window_bounds = array<i64: 1, 324>}, {pipeline_mode = #tpu.pipeline_mode<synchronous>, transform_indices = @transform_2, window_bounds = array<i64: 9, 8, 6>}, {pipeline_mode = #tpu.pipeline_mode<synchronous>, transform_indices = @transform_3, window_bounds = array<i64: 8, 1>}, {pipeline_mode = #tpu.pipeline_mode<synchronous>, transform_indices = @transform_4, window_bounds = array<i64: 6, 8>}, {pipeline_mode = #tpu.pipeline_mode<synchronous>, transform_indices = @transform_5, window_bounds = array<i64: 6, 1>}, {transform_indices = @transform_6, window_bounds = array<i64: 1, 6, 1>}]} {
    %cst = arith.constant 0.000000e+00 : f32
    %0 = vector.broadcast %cst : f32 to vector<8x324xf32>
    %c0 = arith.constant 0 : index
    %c0_0 = arith.constant 0 : index
    %c0_1 = arith.constant 0 : index
    %1 = vector.load %arg1[%c0, %c0_0, %c0_1] : memref<1x6x362xf32, #tpu.memory_space<vmem>>, vector<1x6x324xf32>
    %2 = vector.shape_cast %1 : vector<1x6x324xf32> to vector<6x324xf32>
    %c0_2 = arith.constant 0 : index
    %c0_3 = arith.constant 0 : index
    %c0_4 = arith.constant 0 : index
    %3 = vector.load %arg3[%c0_2, %c0_3, %c0_4] : memref<9x8x6xf32, #tpu.memory_space<vmem>>, vector<1x8x6xf32>
    %4 = vector.shape_cast %3 : vector<1x8x6xf32> to vector<8x6xf32>
    %cst_5 = arith.constant dense<0.000000e+00> : vector<8x324xf32>
    %5 = tpu.matmul %4, %2, %cst_5 {dimension_numbers = #tpu.dot_dimension_numbers<[1], [0], [0], [1], [0, 0, 1, 1], [], []>} : vector<8x6xf32>, vector<6x324xf32>, vector<8x324xf32> -> vector<8x324xf32>
    %6 = arith.addf %0, %5 : vector<8x324xf32>
    %c0_6 = arith.constant 0 : index
    %c0_7 = arith.constant 0 : index
    %c1 = arith.constant 1 : index
    %7 = vector.load %arg1[%c0_6, %c0_7, %c1] : memref<1x6x362xf32, #tpu.memory_space<vmem>>, vector<1x6x324xf32>
    %8 = vector.shape_cast %7 : vector<1x6x324xf32> to vector<6x324xf32>
    %c1_8 = arith.constant 1 : index
    %c0_9 = arith.constant 0 : index
    %c0_10 = arith.constant 0 : index
    %9 = vector.load %arg3[%c1_8, %c0_9, %c0_10] : memref<9x8x6xf32, #tpu.memory_space<vmem>>, vector<1x8x6xf32>
    %10 = vector.shape_cast %9 : vector<1x8x6xf32> to vector<8x6xf32>
    %cst_11 = arith.constant dense<0.000000e+00> : vector<8x324xf32>
    %11 = tpu.matmul %10, %8, %cst_11 {dimension_numbers = #tpu.dot_dimension_numbers<[1], [0], [0], [1], [0, 0, 1, 1], [], []>} : vector<8x6xf32>, vector<6x324xf32>, vector<8x324xf32> -> vector<8x324xf32>
    %12 = arith.addf %6, %11 : vector<8x324xf32>
    %c0_12 = arith.constant 0 : index
    %c0_13 = arith.constant 0 : index
    %c2 = arith.constant 2 : index
    %13 = vector.load %arg1[%c0_12, %c0_13, %c2] : memref<1x6x362xf32, #tpu.memory_space<vmem>>, vector<1x6x324xf32>
    %14 = vector.shape_cast %13 : vector<1x6x324xf32> to vector<6x324xf32>
    %c2_14 = arith.constant 2 : index
    %c0_15 = arith.constant 0 : index
    %c0_16 = arith.constant 0 : index
    %15 = vector.load %arg3[%c2_14, %c0_15, %c0_16] : memref<9x8x6xf32, #tpu.memory_space<vmem>>, vector<1x8x6xf32>
    %16 = vector.shape_cast %15 : vector<1x8x6xf32> to vector<8x6xf32>
    %cst_17 = arith.constant dense<0.000000e+00> : vector<8x324xf32>
    %17 = tpu.matmul %16, %14, %cst_17 {dimension_numbers = #tpu.dot_dimension_numbers<[1], [0], [0], [1], [0, 0, 1, 1], [], []>} : vector<8x6xf32>, vector<6x324xf32>, vector<8x324xf32> -> vector<8x324xf32>
    %18 = arith.addf %12, %17 : vector<8x324xf32>
    %c0_18 = arith.constant 0 : index
    %c0_19 = arith.constant 0 : index
    %c18 = arith.constant 18 : index
    %19 = vector.load %arg1[%c0_18, %c0_19, %c18] : memref<1x6x362xf32, #tpu.memory_space<vmem>>, vector<1x6x324xf32>
    %20 = vector.shape_cast %19 : vector<1x6x324xf32> to vector<6x324xf32>
    %c3 = arith.constant 3 : index
    %c0_20 = arith.constant 0 : index
    %c0_21 = arith.constant 0 : index
    %21 = vector.load %arg3[%c3, %c0_20, %c0_21] : memref<9x8x6xf32, #tpu.memory_space<vmem>>, vector<1x8x6xf32>
    %22 = vector.shape_cast %21 : vector<1x8x6xf32> to vector<8x6xf32>
    %cst_22 = arith.constant dense<0.000000e+00> : vector<8x324xf32>
    %23 = tpu.matmul %22, %20, %cst_22 {dimension_numbers = #tpu.dot_dimension_numbers<[1], [0], [0], [1], [0, 0, 1, 1], [], []>} : vector<8x6xf32>, vector<6x324xf32>, vector<8x324xf32> -> vector<8x324xf32>
    %24 = arith.addf %18, %23 : vector<8x324xf32>
    %c0_23 = arith.constant 0 : index
    %c0_24 = arith.constant 0 : index
    %c19 = arith.constant 19 : index
    %25 = vector.load %arg1[%c0_23, %c0_24, %c19] : memref<1x6x362xf32, #tpu.memory_space<vmem>>, vector<1x6x324xf32>
    %26 = vector.shape_cast %25 : vector<1x6x324xf32> to vector<6x324xf32>
    %c4 = arith.constant 4 : index
    %c0_25 = arith.constant 0 : index
    %c0_26 = arith.constant 0 : index
    %27 = vector.load %arg3[%c4, %c0_25, %c0_26] : memref<9x8x6xf32, #tpu.memory_space<vmem>>, vector<1x8x6xf32>
    %28 = vector.shape_cast %27 : vector<1x8x6xf32> to vector<8x6xf32>
    %cst_27 = arith.constant dense<0.000000e+00> : vector<8x324xf32>
    %29 = tpu.matmul %28, %26, %cst_27 {dimension_numbers = #tpu.dot_dimension_numbers<[1], [0], [0], [1], [0, 0, 1, 1], [], []>} : vector<8x6xf32>, vector<6x324xf32>, vector<8x324xf32> -> vector<8x324xf32>
    %30 = arith.addf %24, %29 : vector<8x324xf32>
    %c0_28 = arith.constant 0 : index
    %c0_29 = arith.constant 0 : index
    %c20 = arith.constant 20 : index
    %31 = vector.load %arg1[%c0_28, %c0_29, %c20] : memref<1x6x362xf32, #tpu.memory_space<vmem>>, vector<1x6x324xf32>
    %32 = vector.shape_cast %31 : vector<1x6x324xf32> to vector<6x324xf32>
    %c5 = arith.constant 5 : index
    %c0_30 = arith.constant 0 : index
    %c0_31 = arith.constant 0 : index
    %33 = vector.load %arg3[%c5, %c0_30, %c0_31] : memref<9x8x6xf32, #tpu.memory_space<vmem>>, vector<1x8x6xf32>
    %34 = vector.shape_cast %33 : vector<1x8x6xf32> to vector<8x6xf32>
    %cst_32 = arith.constant dense<0.000000e+00> : vector<8x324xf32>
    %35 = tpu.matmul %34, %32, %cst_32 {dimension_numbers = #tpu.dot_dimension_numbers<[1], [0], [0], [1], [0, 0, 1, 1], [], []>} : vector<8x6xf32>, vector<6x324xf32>, vector<8x324xf32> -> vector<8x324xf32>
    %36 = arith.addf %30, %35 : vector<8x324xf32>
    %c0_33 = arith.constant 0 : index
    %c0_34 = arith.constant 0 : index
    %c36 = arith.constant 36 : index
    %37 = vector.load %arg1[%c0_33, %c0_34, %c36] : memref<1x6x362xf32, #tpu.memory_space<vmem>>, vector<1x6x324xf32>
    %38 = vector.shape_cast %37 : vector<1x6x324xf32> to vector<6x324xf32>
    %c6 = arith.constant 6 : index
    %c0_35 = arith.constant 0 : index
    %c0_36 = arith.constant 0 : index
    %39 = vector.load %arg3[%c6, %c0_35, %c0_36] : memref<9x8x6xf32, #tpu.memory_space<vmem>>, vector<1x8x6xf32>
    %40 = vector.shape_cast %39 : vector<1x8x6xf32> to vector<8x6xf32>
    %cst_37 = arith.constant dense<0.000000e+00> : vector<8x324xf32>
    %41 = tpu.matmul %40, %38, %cst_37 {dimension_numbers = #tpu.dot_dimension_numbers<[1], [0], [0], [1], [0, 0, 1, 1], [], []>} : vector<8x6xf32>, vector<6x324xf32>, vector<8x324xf32> -> vector<8x324xf32>
    %42 = arith.addf %36, %41 : vector<8x324xf32>
    %c0_38 = arith.constant 0 : index
    %c0_39 = arith.constant 0 : index
    %c37 = arith.constant 37 : index
    %43 = vector.load %arg1[%c0_38, %c0_39, %c37] : memref<1x6x362xf32, #tpu.memory_space<vmem>>, vector<1x6x324xf32>
    %44 = vector.shape_cast %43 : vector<1x6x324xf32> to vector<6x324xf32>
    %c7 = arith.constant 7 : index
    %c0_40 = arith.constant 0 : index
    %c0_41 = arith.constant 0 : index
    %45 = vector.load %arg3[%c7, %c0_40, %c0_41] : memref<9x8x6xf32, #tpu.memory_space<vmem>>, vector<1x8x6xf32>
    %46 = vector.shape_cast %45 : vector<1x8x6xf32> to vector<8x6xf32>
    %cst_42 = arith.constant dense<0.000000e+00> : vector<8x324xf32>
    %47 = tpu.matmul %46, %44, %cst_42 {dimension_numbers = #tpu.dot_dimension_numbers<[1], [0], [0], [1], [0, 0, 1, 1], [], []>} : vector<8x6xf32>, vector<6x324xf32>, vector<8x324xf32> -> vector<8x324xf32>
    %48 = arith.addf %42, %47 : vector<8x324xf32>
    %c0_43 = arith.constant 0 : index
    %c0_44 = arith.constant 0 : index
    %c38 = arith.constant 38 : index
    %49 = vector.load %arg1[%c0_43, %c0_44, %c38] : memref<1x6x362xf32, #tpu.memory_space<vmem>>, vector<1x6x324xf32>
    %50 = vector.shape_cast %49 : vector<1x6x324xf32> to vector<6x324xf32>
    %c8 = arith.constant 8 : index
    %c0_45 = arith.constant 0 : index
    %c0_46 = arith.constant 0 : index
    %51 = vector.load %arg3[%c8, %c0_45, %c0_46] : memref<9x8x6xf32, #tpu.memory_space<vmem>>, vector<1x8x6xf32>
    %52 = vector.shape_cast %51 : vector<1x8x6xf32> to vector<8x6xf32>
    %cst_47 = arith.constant dense<0.000000e+00> : vector<8x324xf32>
    %53 = tpu.matmul %52, %50, %cst_47 {dimension_numbers = #tpu.dot_dimension_numbers<[1], [0], [0], [1], [0, 0, 1, 1], [], []>} : vector<8x6xf32>, vector<6x324xf32>, vector<8x324xf32> -> vector<8x324xf32>
    %54 = arith.addf %48, %53 : vector<8x324xf32>
    %c0_48 = arith.constant 0 : index
    %c0_49 = arith.constant 0 : index
    %55 = vector.load %arg4[%c0_48, %c0_49] : memref<8x1xf32, #tpu.memory_space<vmem>>, vector<8x1xf32>
    %56 = vector.broadcast %55 : vector<8x1xf32> to vector<8x324xf32>
    %57 = arith.addf %54, %56 : vector<8x324xf32>
    %cst_50 = arith.constant 0.000000e+00 : f32
    %58 = vector.broadcast %cst_50 : f32 to vector<8x324xf32>
    %59 = arith.maximumf %57, %58 : vector<8x324xf32>
    %c0_51 = arith.constant 0 : index
    %c0_52 = arith.constant 0 : index
    %60 = vector.load %arg2[%c0_51, %c0_52] : memref<1x324xf32, #tpu.memory_space<vmem>>, vector<1x324xf32>
    %61 = vector.broadcast %60 : vector<1x324xf32> to vector<8x324xf32>
    %62 = arith.mulf %59, %61 : vector<8x324xf32>
    %c0_53 = arith.constant 0 : index
    %c0_54 = arith.constant 0 : index
    %63 = vector.load %arg5[%c0_53, %c0_54] : memref<6x8xf32, #tpu.memory_space<vmem>>, vector<6x8xf32>
    %cst_55 = arith.constant dense<0.000000e+00> : vector<6x324xf32>
    %64 = tpu.matmul %63, %62, %cst_55 {dimension_numbers = #tpu.dot_dimension_numbers<[1], [0], [0], [1], [0, 0, 1, 1], [], []>} : vector<6x8xf32>, vector<8x324xf32>, vector<6x324xf32> -> vector<6x324xf32>
    %cst_56 = arith.constant dense<0.000000e+00> : vector<6xf32>
    %65 = vector.multi_reduction <add>, %64, %cst_56 [1] : vector<6x324xf32> to vector<6xf32>
    %66 = vector.shape_cast %65 : vector<6xf32> to vector<6x1xf32>
    %cst_57 = arith.constant 3.906250e-03 : f32
    %67 = vector.broadcast %cst_57 : f32 to vector<6x1xf32>
    %68 = arith.mulf %66, %67 : vector<6x1xf32>
    %c0_58 = arith.constant 0 : index
    %c0_59 = arith.constant 0 : index
    %69 = vector.load %arg6[%c0_58, %c0_59] : memref<6x1xf32, #tpu.memory_space<vmem>>, vector<6x1xf32>
    %70 = arith.addf %68, %69 : vector<6x1xf32>
    %c0_60 = arith.constant 0 : index
    %c0_61 = arith.constant 0 : index
    %c0_62 = arith.constant 0 : index
    %71 = vector.load %arg7[%c0_60, %c0_61, %c0_62] : memref<1x6x1xf32, #tpu.memory_space<vmem>>, vector<1x6x1xf32>
    %72 = vector.shape_cast %71 : vector<1x6x1xf32> to vector<6x1xf32>
    %73 = vector.shape_cast %70 : vector<6x1xf32> to vector<1x6x1xf32>
    tpu.vector_store %arg7[%c0_60, %c0_61, %c0_62], %73 {strides = array<i32>} : memref<1x6x1xf32, #tpu.memory_space<vmem>>, vector<1x6x1xf32>,
    return
  }
  func.func @transform_0(%arg0: i32) -> (i32, i32, i32) {
    %c0_i32 = arith.constant 0 : i32
    %c0_i32_0 = arith.constant 0 : i32
    %c0_i32_1 = arith.constant 0 : i32
    return %arg0, %c0_i32, %c0_i32_0 : i32, i32, i32
  }
  func.func @transform_1(%arg0: i32) -> (i32, i32) {
    %c0_i32 = arith.constant 0 : i32
    %c0_i32_0 = arith.constant 0 : i32
    %c0_i32_1 = arith.constant 0 : i32
    return %c0_i32, %c0_i32_0 : i32, i32
  }
  func.func @transform_2(%arg0: i32) -> (i32, i32, i32) {
    %c0_i32 = arith.constant 0 : i32
    %c0_i32_0 = arith.constant 0 : i32
    %c0_i32_1 = arith.constant 0 : i32
    %c0_i32_2 = arith.constant 0 : i32
    return %c0_i32, %c0_i32_0, %c0_i32_1 : i32, i32, i32
  }
  func.func @transform_3(%arg0: i32) -> (i32, i32) {
    %c0_i32 = arith.constant 0 : i32
    %c0_i32_0 = arith.constant 0 : i32
    %c0_i32_1 = arith.constant 0 : i32
    return %c0_i32, %c0_i32_0 : i32, i32
  }
  func.func @transform_4(%arg0: i32) -> (i32, i32) {
    %c0_i32 = arith.constant 0 : i32
    %c0_i32_0 = arith.constant 0 : i32
    %c0_i32_1 = arith.constant 0 : i32
    return %c0_i32, %c0_i32_0 : i32, i32
  }
  func.func @transform_5(%arg0: i32) -> (i32, i32) {
    %c0_i32 = arith.constant 0 : i32
    %c0_i32_0 = arith.constant 0 : i32
    %c0_i32_1 = arith.constant 0 : i32
    return %c0_i32, %c0_i32_0 : i32, i32
  }
  func.func @transform_6(%arg0: i32) -> (i32, i32, i32) {
    %c0_i32 = arith.constant 0 : i32
    %c0_i32_0 = arith.constant 0 : i32
    %c0_i32_1 = arith.constant 0 : i32
    return %arg0, %c0_i32, %c0_i32_0 : i32, i32, i32
  }
}

</mosaic_0001>

<bundles_post_ra>
// kernel: mono_depth_pair_forward.3
= control target key start
LH: loop header
LB: loop body
LE: loop exit
PB: predicated region body
PF: predicated region fallthrough
CT: control target
= control target key end

     0   :  { %s2187_s21 = smov 0   ;;  %s2346_s0 = inlined_call_operand.vmem [shape: f32[8,6,362], index: 0, kind: input, shape index: {}]   ;;  %s2347_s1 = inlined_call_operand.vmem [shape: f32[1,324], index: 1, kind: input, shape index: {}]   ;;  %s2348_s2 = inlined_call_operand.vmem [shape: f32[9,8,6], index: 2, kind: input, shape index: {}]   ;;  %s2349_s3 = inlined_call_operand.vmem [shape: f32[8,1], index: 3, kind: input, shape index: {}]   ;;  %s2350_s4 = inlined_call_operand.vmem [shape: f32[6,8], index: 4, kind: input, shape index: {}]   ;;  %s2351_s5 = inlined_call_operand.vmem [shape: f32[6,1], index: 5, kind: input, shape index: {}]   ;;  %s2352_s6 = inlined_call_operand.vmem [shape: f32[8,6,1], index: 6, kind: output, shape index: {}]  }
   0x1 LB: > { %s1962_s22 = sadd.s32 4294967295, %s2139_s21   ;;  %p1966_p0 = scmp.ge.s32.totalorder %s2139_s21, 1  ;;  %s2139_s21 = sphi %s2187_s21, %s16_s21  }
   0x2   : > { %p212_p1 = scmp.lt.s32.totalorder %s2139_s21, 9 }
   0x4   : > { %p213_p2 = pnand %p1966_p0, %p212_p1 }
   0x5   : > { %p241_p3 = scmp.lt.s32.totalorder (!%p213_p2), %s1962_s22, 7  ;;  %v2141_v0 = vmov (!%p213_p2), 0.0   ;;  %vm2142_vm0 = vmmov (!%p213_p2), 0   ;;  %s2143_s27 = smov (!%p213_p2), 127   ;;  %v1718_v4 = vld [vmem:[%s2349_s3] sm:$0xff] (!%p213_p2)  ;;  %v2151_v5 = vmov (!%p213_p2), 0  }
   0x6   : > { %216 = sbr.rel (%p213_p2) target bundleno = 790 (0x316), region = 44  ;;  %2046 = vmatprep.subr.mxu1 (!%p213_p2), %v2141_v0  ;;  %343 = vmatprep.mubr.f32.mxu0 (!%p213_p2), %v2141_v0  ;;  %s2144_s28 = smov (!%p213_p2), 126   ;;  %vm272_vm1 = vcmask (!%p213_p2), 1045504   ;;  %vm265_vm2 = vcmask (!%p213_p2), 1039360   ;;  %v1969_v11 = vld [vmem:[%s2348_s2 + $0x8] sm:$0xff] (!%p213_p2)  ;;  %vm268_vm3 = vcmask (!%p213_p2), 48128  }
   0x7   : > { %2048 = vmatprep.mubr.msk.f32.mxu1 (!%p213_p2), %vm2142_vm0, %v2141_v0  ;;  %s2145_s29 = smov (!%p213_p2), 110   ;;  %s2146_s30 = smov (!%p213_p2), 109   ;;  %2132 = vset.pattern.permute.xlu0 (!%p213_p2), %v2151_v5  ;;  %vm578_vm4 = vcmask (!%p213_p2), 1031168   ;;  %v253_v16 = vld [vmem:[%s2348_s2] sm:$0xff] (!%p213_p2)  ;;  %vm742_vm5 = vcmask (!%p213_p2), 900096   ;;  %v1980_v21 = vld [vmem:[%s2348_s2 + $0x10] sm:$0xff] (!%p213_p2) }
   0x8   : > { %s2147_s7 = smov (!%p213_p2), 108   ;;  %s2148_s8 = smov (!%p213_p2), 92   ;;  %v1986_v24 = vld [vmem:[%s2348_s2 + $0x18] sm:$0xff] (!%p213_p2)  ;;  %vm906_vm6 = vcmask (!%p213_p2), 891904   ;;  %v1992_v27 = vld [vmem:[%s2348_s2 + $0x20] sm:$0xff] (!%p213_p2)  ;;  %v1998_v32 = vld [vmem:[%s2348_s2 + $0x28] sm:$0xff] (!%p213_p2) }
   0x9   : > { %s2149_s9 = smov (!%p213_p2), 91   ;;  %s2150_s10 = smov (!%p213_p2), 90   ;;  %vm1070_vm7 = vcmask (!%p213_p2), 883712   ;;  %v2004_v39 = vld [vmem:[%s2348_s2 + $0x30] sm:$0xff] (!%p213_p2)  ;;  %vm1234_vm8 = vcmask (!%p213_p2), 752640   ;;  %v2010_v42 = vld [vmem:[%s2348_s2 + $0x38] sm:$0xff] (!%p213_p2) }
   0xa   : > { %v2016_v46 = vld [vmem:[%s2348_s2 + $0x40] sm:$0xff] (!%p213_p2)  ;;  %vm1398_vm9 = vcmask (!%p213_p2), 744448   ;;  %vm1562_vm10 = vcmask (!%p213_p2), 736256   ;;  %vm1751_vm11 = vcmask (!%p213_p2), 64512   ;;  %vm1899_vm12 = vcmask (!%p213_p2), 553984  }
   0xb   : > { %vm1907_vm13 = vcmask (!%p213_p2), 5120  }
   0xd   : > { %s2354_s22 = smov (!%p241_p3, %s1962_s22), 7 }
   0xe   : > { %s2112_s23 = smul.u32 24, %s2354_s22  ;;  %s1968_s13 = sshll.u32 %s2354_s22, 3 }
   0xf   : > { %s249_s18 = scalar_lea.vmem %s2352_s6, %s1968_s13 }
  0x10   : > { %s245_s26 = scalar_lea.vmem %s2346_s0, %s2112_s23 }
  0x11   : > { %v251_v1 = vld [vmem:[%s245_s26 + $0x8] sm:$0x3f]  ;;  %v250_v2 = vld [vmem:[%s245_s26] sm:$0x3f]  ;;  %v252_v3 = vld [vmem:[%s245_s26 + $0x10] sm:$0x3f] }
  0x12   : > { %261 = vrot.lane.b32.xlu0 %v251_v1, %s2143_s27  ;;  %259 = vrot.lane.b32.xlu1 %v250_v2, %s2143_s27 }
  0x16   : > { %263 = vrot.lane.b32.xlu0 %v252_v3, %s2143_s27  ;;  %574 = vrot.lane.b32.xlu1 %v251_v1, %s2144_s28 }
  0x1a   : > { %576 = vrot.lane.b32.xlu0 %v252_v3, %s2144_s28  ;;  %572 = vrot.lane.b32.xlu1 %v250_v2, %s2144_s28 }
  0x1e   : > { %738 = vrot.lane.b32.xlu0 %v251_v1, %s2145_s29  ;;  %740 = vrot.lane.b32.xlu1 %v252_v3, %s2145_s29 }
  0x22   : > { %736 = vrot.lane.b32.xlu0 %v250_v2, %s2145_s29  ;;  %902 = vrot.lane.b32.xlu1 %v251_v1, %s2146_s30 }
  0x26   : > { %904 = vrot.lane.b32.xlu0 %v252_v3, %s2146_s30  ;;  %900 = vrot.lane.b32.xlu1 %v250_v2, %s2146_s30 }
  0x2a   : > { %1066 = vrot.lane.b32.xlu0 %v251_v1, %s2147_s7  ;;  %1068 = vrot.lane.b32.xlu1 %v252_v3, %s2147_s7 }
  0x2e   : > { %1064 = vrot.lane.b32.xlu0 %v250_v2, %s2147_s7  ;;  %1230 = vrot.lane.b32.xlu1 %v251_v1, %s2148_s8 }
  0x32   : > { %1232 = vrot.lane.b32.xlu0 %v252_v3, %s2148_s8  ;;  %1228 = vrot.lane.b32.xlu1 %v250_v2, %s2148_s8 }
  0x36   : > { %1394 = vrot.lane.b32.xlu0 %v251_v1, %s2149_s9  ;;  %1396 = vrot.lane.b32.xlu1 %v252_v3, %s2149_s9 }
  0x3a   : > { %1392 = vrot.lane.b32.xlu0 %v250_v2, %s2149_s9  ;;  %1558 = vrot.lane.b32.xlu1 %v251_v1, %s2150_s10 }
  0x3e   : > { %1560 = vrot.lane.b32.xlu0 %v252_v3, %s2150_s10  ;;  %1556 = vrot.lane.b32.xlu1 %v250_v2, %s2150_s10 }
  0x42   : > { %1721 = vperm.xlu0 %2132, %v1718_v4  }
  0x84   : > { %v262_v6 = vpop.permute.xlu0 %261  ;;  %v260_v7 = vpop.permute.xlu1 %259 }
  0x85   : > { %v266_v12 = vsel %vm265_vm2, %v260_v7, %v262_v6 }
  0x88   : > { %v264_v8 = vpop.permute.xlu0 %263  ;;  %v575_v9 = vpop.permute.xlu1 %574 }
  0x89   : > { %2047 = vmatpush3.msk.msra.mxu1 %vm272_vm1, %v264_v8  ;;  %v267_v10 = vsel %vm265_vm2, %v262_v6, %v264_v8 }
  0x8a   : > { %1970 = vmatprep.subr.msk.mxu0 %vm272_vm1, %v267_v10  ;;  %2049 = vmatmul.mubr.msk.f32.vlgmr.msra.gmra.mrb[0].mxu1 %vm268_vm3, %v1969_v11 }
  0x8b   : > { %1971 = vmatpush1.msk.msra.mxu0 %vm272_vm1, %v266_v12  ;;  %2051 = vmatprep.subr.mxu1 %v2141_v0 }
  0x8c   : > { %1972 = vmatmul.mubr.msk.f32.vlgmr.msra.gmra.mrb[0].mxu0 %vm268_vm3, %v1969_v11  ;;  %1975 = vmatprep.subr.msk.mxu0 %vm272_vm1, %v251_v1  ;;  %v577_v13 = vpop.permute.xlu0 %576  ;;  %v573_v14 = vpop.permute.xlu1 %572  ;;  %v1732_v11 = vlaneseq }
  0x8d   : > { %1976 = vmatpush1.msk.msra.mxu0 %vm272_vm1, %v250_v2  ;;  %v580_v15 = vsel %vm578_vm4, %v575_v9, %v577_v13  ;;  %493 = vmatprep.mubr.f32.mxu0 %v2141_v0  ;;  %v579_v19 = vsel %vm578_vm4, %v573_v14, %v575_v9 }
  0x8e   : > { %2052 = vmatpush3.msk.msra.mxu1 %vm272_vm1, %v252_v3  ;;  %1981 = vmatprep.subr.msk.mxu0 %vm272_vm1, %v580_v15  ;;  %v1733_v15 = vshrl.u32 %v1732_v11, 7 }
  0x8f   : > { %2053 = vmatprep.mubr.msk.f32.mxu1 %vm2142_vm0, %v2141_v0  ;;  %2056 = vmatprep.subr.mxu1 %v2141_v0 }
  0x90   : > { %2054 = vmatmul.mubr.msk.f32.vlgmr.msra.gmra.mrb[2].mxu1 %vm268_vm3, %v253_v16  ;;  %v739_v17 = vpop.permute.xlu0 %738  ;;  %v741_v18 = vpop.permute.xlu1 %740 }
  0x91   : > { %2057 = vmatpush3.msk.msra.mxu1 %vm272_vm1, %v577_v13  ;;  %2058 = vmatprep.mubr.msk.f32.mxu1 %vm2142_vm0, %v2141_v0  ;;  %v744_v20 = vsel %vm742_vm5, %v739_v17, %v741_v18 }
  0x92   : > { %2061 = vmatprep.subr.mxu1 %v2141_v0 }
  0x94   : > { %1977 = vmatmul.mubr.msk.f32.vlgmr.msra.gmra.mrb[0].mxu0 %vm268_vm3, %v253_v16  ;;  %v737_v22 = vpop.permute.xlu0 %736  ;;  %2059 = vmatmul.mubr.msk.f32.vlgmr.msra.gmra.mrb[4].mxu1 %vm268_vm3, %v1980_v21  ;;  %v903_v23 = vpop.permute.xlu1 %902  ;;  %v1742_v16 = vsub.s32 2, %v1733_v15 }
  0x95   : > { %1982 = vmatpush1.msk.msra.mxu0 %vm272_vm1, %v579_v19  ;;  %654 = vmatprep.mubr.f32.mxu0 %v2141_v0  ;;  %v743_v28 = vsel %vm742_vm5, %v737_v22, %v739_v17 }
  0x96   : > { %1987 = vmatprep.subr.msk.mxu0 %vm272_vm1, %v744_v20  ;;  %2062 = vmatpush3.msk.msra.mxu1 %vm272_vm1, %v741_v18  ;;  %v1730_v18 = vld [vmem:[%s2347_s1] sm:$0x7] }
  0x97   : > { %2063 = vmatprep.mubr.msk.f32.mxu1 %vm2142_vm0, %v2141_v0  ;;  %2066 = vmatprep.subr.mxu1 %v2141_v0  ;;  %v1743_v22 = vrot.slane %v1730_v18, %v1742_v16 }
  0x98   : > { %v905_v25 = vpop.permute.xlu0 %904  ;;  %v901_v26 = vpop.permute.xlu1 %900  ;;  %2064 = vmatmul.mubr.msk.f32.vlgmr.msra.gmra.mrb[6].mxu1 %vm268_vm3, %v1986_v24 }
  0x99   : > { %2067 = vmatpush3.msk.msra.mxu1 %vm272_vm1, %v905_v25  ;;  %2068 = vmatprep.mubr.msk.f32.mxu1 %vm2142_vm0, %v2141_v0  ;;  %v908_v29 = vsel %vm906_vm6, %v903_v23, %v905_v25  ;;  %v907_v35 = vsel %vm906_vm6, %v901_v26, %v903_v23  ;;  %v1750_v26 = vld [vmem:[%s2350_s4] sm:$0x3f] }
  0x9a   : > { %2071 = vmatprep.subr.mxu1 %v2141_v0 }
  0x9c   : > { %1983 = vmatmul.mubr.msk.f32.vlgmr.msra.gmra.mrb[0].mxu0 %vm268_vm3, %v1980_v21  ;;  %v1067_v30 = vpop.permute.xlu0 %1066  ;;  %v1069_v31 = vpop.permute.xlu1 %1068  ;;  %2069 = vmatmul.mubr.msk.f32.vlgmr.msra.gmra.mrb[8].mxu1 %vm268_vm3, %v1992_v27 }
  0x9d   : > { %1988 = vmatpush1.msk.msra.mxu0 %vm272_vm1, %v743_v28  ;;  %818 = vmatprep.mubr.f32.mxu0 %v2141_v0  ;;  %v1072_v36 = vsel %vm1070_vm7, %v1067_v30, %v1069_v31  ;;  %v1734_v28 = vsub.s32 0, %v1733_v15 }
  0x9e   : > { %1993 = vmatprep.subr.msk.mxu0 %vm272_vm1, %v908_v29  ;;  %2072 = vmatpush3.msk.msra.mxu1 %vm272_vm1, %v1069_v31 }
  0x9f   : > { %2073 = vmatprep.mubr.msk.f32.mxu1 %vm2142_vm0, %v2141_v0  ;;  %2076 = vmatprep.subr.mxu1 %v2141_v0 }
  0xa0   : > { %v1065_v33 = vpop.permute.xlu0 %1064  ;;  %v1231_v34 = vpop.permute.xlu1 %1230  ;;  %2074 = vmatmul.mubr.msk.f32.vlgmr.msra.gmra.mrb[10].mxu1 %vm268_vm3, %v1998_v32 }
  0xa1   : > { %2078 = vmatprep.mubr.msk.f32.mxu1 %vm2142_vm0, %v2141_v0  ;;  %v1071_v43 = vsel %vm1070_vm7, %v1065_v33, %v1067_v30 }
  0xa4   : > { %1989 = vmatmul.mubr.msk.f32.vlgmr.msra.gmra.mrb[0].mxu0 %vm268_vm3, %v1986_v24  ;;  %v1233_v37 = vpop.permute.xlu0 %1232  ;;  %v1229_v38 = vpop.permute.xlu1 %1228 }
  0xa5   : > { %1994 = vmatpush1.msk.msra.mxu0 %vm272_vm1, %v907_v35  ;;  %982 = vmatprep.mubr.f32.mxu0 %v2141_v0  ;;  %v1236_v44 = vsel %vm1234_vm8, %v1231_v34, %v1233_v37  ;;  %v1235_v48 = vsel %vm1234_vm8, %v1229_v38, %v1231_v34  ;;  %v1735_v35 = vrot.slane %v1730_v18, %v1734_v28 }
  0xa6   : > { %1999 = vmatprep.subr.msk.mxu0 %vm272_vm1, %v1072_v36  ;;  %2077 = vmatpush3.msk.msra.mxu1 %vm272_vm1, %v1233_v37 }
  0xa7   : > { %2079 = vmatmul.mubr.msk.f32.vlgmr.msra.gmra.mrb[12].mxu1 %vm268_vm3, %v2004_v39  ;;  %2081 = vmatprep.subr.mxu1 %v2141_v0 }
  0xa8   : > { %v1395_v40 = vpop.permute.xlu0 %1394  ;;  %v1397_v41 = vpop.permute.xlu1 %1396  ;;  %2083 = vmatprep.mubr.msk.f32.mxu1 %vm2142_vm0, %v2141_v0 }
  0xa9   : > { %2082 = vmatpush3.msk.msra.mxu1 %vm272_vm1, %v1397_v41  ;;  %v1400_v49 = vsel %vm1398_vm9, %v1395_v40, %v1397_v41 }
  0xaa   : > { %2086 = vmatprep.subr.mxu1 %v2141_v0 }
  0xab   : > { %2084 = vmatmul.mubr.msk.f32.vlgmr.msra.gmra.mrb[14].mxu1 %vm268_vm3, %v2010_v42 }
  0xac   : > { %1995 = vmatmul.mubr.msk.f32.vlgmr.msra.gmra.mrb[0].mxu0 %vm268_vm3, %v1992_v27  ;;  %v1393_v45 = vpop.permute.xlu0 %1392  ;;  %2088 = vmatprep.mubr.msk.f32.mxu1 %vm2142_vm0, %v2141_v0  ;;  %v1559_v50 = vpop.permute.xlu1 %1558  ;;  %v1738_v27 = vsub.s32 1, %v1733_v15 }
  0xad   : > { %2000 = vmatpush1.msk.msra.mxu0 %vm272_vm1, %v1071_v43  ;;  %1146 = vmatprep.mubr.f32.mxu0 %v2141_v0  ;;  %v1399_v51 = vsel %vm1398_vm9, %v1393_v45, %v1395_v40 }
  0xae   : > { %2005 = vmatprep.subr.msk.mxu0 %vm272_vm1, %v1236_v44  ;;  %v1739_v33 = vrot.slane %v1730_v18, %v1738_v27 }
  0xb0   : > { %v1561_v47 = vpop.permute.xlu0 %1560  ;;  %v1557_v53 = vpop.permute.xlu1 %1556 }
  0xb1   : > { %2087 = vmatpush3.msk.msra.mxu1 %vm272_vm1, %v1561_v47  ;;  %v1564_v52 = vsel %vm1562_vm10, %v1559_v50, %v1561_v47  ;;  %v1563_v54 = vsel %vm1562_vm10, %v1557_v53, %v1559_v50 }
  0xb2   : > { %2089 = vmatmul.mubr.msk.f32.vlgmr.msra.gmra.mrb[16].mxu1 %vm268_vm3, %v2016_v46  ;;  %2091 = vmatprep.subr.mxu1 %v2141_v0 }
  0xb3   : > { %2093 = vmatprep.mubr.msk.f32.mxu1 %vm2142_vm0, %v2141_v0 }
  0xb4   : > { %2001 = vmatmul.mubr.msk.f32.vlgmr.msra.gmra.mrb[0].mxu0 %vm268_vm3, %v1998_v32 }
  0xb5   : > { %2006 = vmatpush1.msk.msra.mxu0 %vm272_vm1, %v1235_v48  ;;  %1310 = vmatprep.mubr.f32.mxu0 %v2141_v0  ;;  %v1905_v48 = vld [vmem:[%s2351_s5] sm:$0x3f] }
  0xb6   : > { %2011 = vmatprep.subr.msk.mxu0 %vm272_vm1, %v1400_v49 }
  0xbc   : > { %2007 = vmatmul.mubr.msk.f32.vlgmr.msra.gmra.mrb[0].mxu0 %vm268_vm3, %v2004_v39 }
  0xbd   : > { %2012 = vmatpush1.msk.msra.mxu0 %vm272_vm1, %v1399_v51  ;;  %1474 = vmatprep.mubr.f32.mxu0 %v2141_v0 }
  0xbe   : > { %2017 = vmatprep.subr.msk.mxu0 %vm272_vm1, %v1564_v52 }
  0xc1   : > { %v1722_v19 = vpop.permute.xlu0 %1721 }
  0xc4   : > { %2013 = vmatmul.mubr.msk.f32.vlgmr.msra.gmra.mrb[0].mxu0 %vm268_vm3, %v2010_v42 }
  0xc5   : > { %2018 = vmatpush1.msk.msra.mxu0 %vm272_vm1, %v1563_v54  ;;  %1638 = vmatprep.mubr.f32.mxu0 %v2141_v0 }
  0xcc   : > { %2019 = vmatmul.mubr.msk.f32.vlgmr.msra.gmra.mrb[0].mxu0 %vm268_vm3, %v2016_v46 }
  0xcd   : > { %1819 = vmatprep.mubr.f32.mxu0 %v2141_v0 }
 0x15d   : > { %v416_v55 = vpop.f32.mrb[0].mxu1 }
 0x15e   : > { %v2050_v56 = vpop.f32.mrb[1].mxu1 }
 0x163   : > { %v566_v57 = vpop.f32.mrb[2].mxu1 }
 0x164   : > { %v567_v58 = vadd.f32 %v566_v57, %v416_v55  ;;  %v2055_v59 = vpop.f32.mrb[3].mxu1 }
 0x167   : > { %v727_v60 = vpop.f32.mrb[4].mxu1 }
 0x168   : > { %v733_v61 = vadd.f32 %v727_v60, %v567_v58  ;;  %v2060_v62 = vpop.f32.mrb[5].mxu1 }
 0x16b   : > { %v891_v63 = vpop.f32.mrb[6].mxu1 }
 0x16c   : > { %v897_v1 = vadd.f32 %v891_v63, %v733_v61  ;;  %v2065_v2 = vpop.f32.mrb[7].mxu1 }
 0x16f   : > { %v1055_v3 = vpop.f32.mrb[8].mxu1 }
 0x170   : > { %v1061_v4 = vadd.f32 %v1055_v3, %v897_v1  ;;  %v2070_v5 = vpop.f32.mrb[9].mxu1 }
 0x173   : > { %v1219_v6 = vpop.f32.mrb[10].mxu1 }
 0x174   : > { %v1225_v7 = vadd.f32 %v1219_v6, %v1061_v4  ;;  %v2075_v8 = vpop.f32.mrb[11].mxu1 }
 0x17a   : > { %v1383_v9 = vpop.f32.mrb[12].mxu1 }
 0x17b   : > { %v1389_v10 = vadd.f32 %v1383_v9, %v1225_v7  ;;  %v2080_v0 = vpop.f32.mrb[13].mxu1 }
 0x17e   : > { %v1547_v12 = vpop.f32.mrb[14].mxu1 }
 0x17f   : > { %v1553_v13 = vadd.f32 %v1547_v12, %v1389_v10  ;;  %v2085_v14 = vpop.f32.mrb[15].mxu1 }
 0x185   : > { %v1711_v17 = vpop.f32.mrb[16].mxu1 }
 0x186   : > { %v1717_v20 = vadd.f32 %v1711_v17, %v1553_v13  ;;  %v2090_v21 = vpop.f32.mrb[17].mxu1 }
 0x188   : > { %v1726_v23 = vadd.f32 %v1722_v19, %v1717_v20 }
 0x18a   : > { %v1729_v24 = vmax.f32 %v1726_v23, 0.0 }
 0x18c   : > { %v1749_v25 = vmul.f32 %v1743_v22, %v1729_v24 }
 0x18e   : > { %2092 = vmatpush3.msra.mxu1 %v1749_v25 }
 0x18f   : > { %2094 = vmatmul.mubr.msk.f32.vlgmr.msra.gmra.mrb[18].mxu1 %vm1751_vm11, %v1750_v26 }
 0x19f   : > { %v1640_v29 = vpop.f32.mrb[0].mxu0 }
 0x1a0   : > { %v1724_v30 = vadd.f32 %v1722_v19, %v1640_v29  ;;  %v1642_v31 = vpop.f32.mrb[1].mxu0 }
 0x1a1   : > { %v1725_v32 = vadd.f32 %v1722_v19, %v1642_v31 }
 0x1a2   : > { %v1727_v34 = vmax.f32 %v1724_v30, 0.0 }
 0x1a3   : > { %v1728_v36 = vmax.f32 %v1725_v32, 0.0 }
 0x1a4   : > { %v1747_v38 = vmul.f32 %v1735_v35, %v1727_v34 }
 0x1a5   : > { %v1748_v37 = vmul.f32 %v1739_v33, %v1728_v36 }
 0x1a7   : > { %1755 = vmatprep.subr.mxu0 %v1748_v37 }
 0x1a8   : > { %1756 = vmatpush1.msra.mxu0 %v1747_v38 }
 0x1a9   : > { %2022 = vmatmul.mubr.msk.f32.vlgmr.msra.gmra.mrb[2].mxu0 %vm1751_vm11, %v1750_v26 }
 0x262   : > { %v1892_v39 = vpop.f32.mrb[18].mxu1 }
 0x263   : > { %v2095_v40 = vpop.f32.mrb[19].mxu1  ;;  %v1900_v45 = vsel %vm1899_vm12, %v1892_v39, 0.0 }
 0x27c   : > { %v1821_v41 = vpop.f32.mrb[2].mxu0 }
 0x27d   : > { %v1896_v42 = vsel %vm272_vm1, %v1821_v41, 0.0  ;;  %v1823_v43 = vpop.f32.mrb[3].mxu0 }
 0x27e   : > { %v1897_v44 = vsel %vm272_vm1, %v1823_v43, 0.0 }
 0x27f   : > { %v1898_v46 = vadd.f32 %v1897_v44, %v1896_v42 }
 0x281   : > { %v1901_v47 = vadd.f32 %v1900_v45, %v1898_v46 }
 0x283   : > { %1902 = vadd.xlane.f32.xlu1 %v1901_v47 }
 0x310   : > { %v1903_v49 = vpop.xlane.xlu1 %1902 }
 0x311   : > { %v1904_v50 = vmul.f32 0.00390625, %v1903_v49 }
 0x313   : > { %v1906_v51 = vadd.f32 %v1905_v48, %v1904_v50 }
 0x315   : > { %1908 = vst.msk [vmem:[%s249_s18] sm:$0x3f] %vm1907_vm13, %v1906_v51 }
 0x316 PF: > { %s16_s21 = sadd.s32 1, %s2139_s21  }
 0x317   : > { %p13_p4 = scmp.ge.s32.totalorder %s16_s21, 10  }
 0x319   :  { %15 = sbr.rel (!%p13_p4) target bundleno = 1 (0x1), region = 82 }

// kernel: mono_depth_pair_forward.2
= control target key start
LH: loop header
LB: loop body
LE: loop exit
PB: predicated region body
PF: predicated region fallthrough
CT: control target
= control target key end

     0   :  { %s3691_s21 = smov 0   ;;  %s4034_s0 = inlined_call_operand.vmem [shape: f32[6,3,400], index: 0, kind: input, shape index: {}]   ;;  %s4035_s1 = inlined_call_operand.vmem [shape: f32[1,362], index: 1, kind: input, shape index: {}]   ;;  %s4036_s2 = inlined_call_operand.vmem [shape: f32[9,8,3], index: 2, kind: input, shape index: {}]   ;;  %s4037_s3 = inlined_call_operand.vmem [shape: f32[8,1], index: 3, kind: input, shape index: {}]   ;;  %s4038_s4 = inlined_call_operand.vmem [shape: f32[9,2,8], index: 4, kind: input, shape index: {}]   ;;  %s4039_s5 = inlined_call_operand.vmem [shape: f32[2,1], index: 5, kind: input, shape index: {}]   ;;  %s4040_s6 = inlined_call_operand.vmem [shape: f32[6,2,324], index: 6, kind: output, shape index: {}]  }
   0x1 LB: > { %s3339_s22 = sadd.s32 4294967295, %s3642_s21   ;;  %p3343_p0 = scmp.ge.s32.totalorder %s3642_s21, 1  ;;  %s3642_s21 = sphi %s3691_s21, %s16_s21  }
   0x2   : > { %p212_p1 = scmp.lt.s32.totalorder %s3642_s21, 7 }
   0x4   : > { %p213_p2 = pnand %p3343_p0, %p212_p1 }
   0x5   : > { %p242_p3 = scmp.lt.s32.totalorder (!%p213_p2), %s3339_s22, 5  ;;  %v3644_v0 = vmov (!%p213_p2), 0.0   ;;  %vm3645_vm0 = vmmov (!%p213_p2), 0   ;;  %s3646_s27 = smov (!%p213_p2), 127   ;;  %v1766_v28 = vld [vmem:[%s4037_s3] sm:$0xff] (!%p213_p2)  ;;  %v3654_v29 = vmov (!%p213_p2), 0  }
   0x6   : > { %216 = sbr.rel (%p213_p2) target bundleno = 857 (0x359), region = 44  ;;  %3468 = vmatprep.subr.mxu1 (!%p213_p2), %v3644_v0  ;;  %344 = vmatprep.mubr.f32.mxu0 (!%p213_p2), %v3644_v0  ;;  %s3647_s28 = smov (!%p213_p2), 126   ;;  %vm273_vm1 = vcmask (!%p213_p2), 1042432   ;;  %vm266_vm2 = vcmask (!%p213_p2), 1039360   ;;  %v3347_v35 = vld [vmem:[%s4036_s2 + $0x8] sm:$0xff] (!%p213_p2)  ;;  %vm269_vm3 = vcmask (!%p213_p2), 23552  }
   0x7   : > { %3470 = vmatprep.mubr.msk.f32.mxu1 (!%p213_p2), %vm3645_vm0, %v3644_v0  ;;  %s3648_s29 = smov (!%p213_p2), 110   ;;  %s3649_s30 = smov (!%p213_p2), 109   ;;  %3611 = vset.pattern.permute.xlu1 (!%p213_p2), %v3654_v29  ;;  %vm584_vm4 = vcmask (!%p213_p2), 1031168   ;;  %v254_v41 = vld [vmem:[%s4036_s2] sm:$0xff] (!%p213_p2)  ;;  %vm753_vm5 = vcmask (!%p213_p2), 900096   ;;  %v3358_v46 = vld [vmem:[%s4036_s2 + $0x10] sm:$0xff] (!%p213_p2) }
   0x8   : > { %s3650_s7 = smov (!%p213_p2), 108   ;;  %s3651_s8 = smov (!%p213_p2), 92   ;;  %3612 = vset.pattern.permute.xlu0 (!%p213_p2), %v3654_v29  ;;  %v3364_v48 = vld [vmem:[%s4036_s2 + $0x18] sm:$0xff] (!%p213_p2)  ;;  %vm922_vm6 = vcmask (!%p213_p2), 891904   ;;  %v3370_v51 = vld [vmem:[%s4036_s2 + $0x20] sm:$0xff] (!%p213_p2)  ;;  %v3376_v56 = vld [vmem:[%s4036_s2 + $0x28] sm:$0xff] (!%p213_p2) }
   0x9   : > { %s3652_s9 = smov (!%p213_p2), 91   ;;  %s3653_s10 = smov (!%p213_p2), 90   ;;  %vm1091_vm7 = vcmask (!%p213_p2), 883712   ;;  %vm1263_vm8 = vcmask (!%p213_p2), 752640   ;;  %vm1436_vm9 = vcmask (!%p213_p2), 744448   ;;  %vm1609_vm10 = vcmask (!%p213_p2), 736256  }
   0xa   : > { %vm1800_vm11 = vcmask (!%p213_p2), 867328   ;;  %vm1822_vm12 = vcmask (!%p213_p2), 64512   ;;  %vm3278_vm13 = vcmask (!%p213_p2), 1041408   ;;  %vm3279_vm14 = vcmask (!%p213_p2), 1043458  }
   0xb   : > { %vm3280_vm15 = vmor (!%p213_p2), %vm3279_vm14, %vm3278_vm13 }
   0xd   : > { %s4042_s22 = smov (!%p242_p3, %s3339_s22), 5 }
   0xe   : > { %s3431_s23 = sshll.u32 %s4042_s22, 4  ;;  %s3590_s17 = smul.u32 6, %s4042_s22 }
   0xf   : > { %s3707_s26 = scalar_lea.vmem %s4034_s0, %s3431_s23 }
  0x10   : > { %v3712_v1 = vld [vmem:[%s3707_s26] sm:$0x77]  ;;  %v3724_v5 = vld [vmem:[%s3707_s26 + $0x8] sm:$0x7] }
  0x11   : > { %v571_v2 = vld [vmem:[%s3707_s26] sm:$0x77]  ;;  %260 = vrot.lane.b32.xlu1 %v3712_v1, %s3646_s27  ;;  %v3719_v3 = vcombine.high %v3712_v1, %v3712_v1  ;;  %v572_v6 = vld [vmem:[%s3707_s26 + $0x8] sm:$0x7] }
  0x12   : > { %v577_v4 = vcombine.high %v571_v2, %v571_v2  ;;  %v740_v7 = vld [vmem:[%s3707_s26] sm:$0x77]  ;;  %v741_v8 = vld [vmem:[%s3707_s26 + $0x8] sm:$0x7] }
  0x13   : > { %262 = vrot.lane.b32.xlu0 %v3719_v3, %s3646_s27  ;;  %v909_v9 = vld [vmem:[%s3707_s26] sm:$0x77]  ;;  %v746_v10 = vcombine.high %v740_v7, %v740_v7  ;;  %v910_v12 = vld [vmem:[%s3707_s26 + $0x8] sm:$0x7] }
  0x14   : > { %v915_v11 = vcombine.high %v909_v9, %v909_v9  ;;  %v1078_v13 = vld [vmem:[%s3707_s26] sm:$0x77]  ;;  %v1079_v14 = vld [vmem:[%s3707_s26 + $0x8] sm:$0x7] }
  0x15   : > { %580 = vrot.lane.b32.xlu1 %v577_v4, %s3647_s28  ;;  %v1247_v15 = vld [vmem:[%s3707_s26] sm:$0x77]  ;;  %v1084_v16 = vcombine.high %v1078_v13, %v1078_v13  ;;  %v1248_v19 = vld [vmem:[%s3707_s26 + $0x8] sm:$0x77] }
  0x16   : > { %v1253_v17 = vcombine.high %v1247_v15, %v1247_v15  ;;  %v1420_v18 = vld [vmem:[%s3707_s26] sm:$0x77]  ;;  %v1254_v21 = vcombine.high %v1248_v19, %v1248_v19  ;;  %v1421_v23 = vld [vmem:[%s3707_s26 + $0x8] sm:$0x77] }
  0x17   : > { %264 = vrot.lane.b32.xlu0 %v3724_v5, %s3646_s27  ;;  %v1426_v20 = vcombine.high %v1420_v18, %v1420_v18  ;;  %v1593_v22 = vld [vmem:[%s3707_s26] sm:$0x77]  ;;  %v1594_v25 = vld [vmem:[%s3707_s26 + $0x8] sm:$0x77]  ;;  %v1427_v26 = vcombine.high %v1421_v23, %v1421_v23 }
  0x18   : > { %v1599_v24 = vcombine.high %v1593_v22, %v1593_v22  ;;  %v1600_v27 = vcombine.high %v1594_v25, %v1594_v25 }
  0x19   : > { %578 = vrot.lane.b32.xlu1 %v571_v2, %s3647_s28  ;;  %v3382_v2 = vld [vmem:[%s4036_s2 + $0x30] sm:$0xff] }
  0x1b   : > { %582 = vrot.lane.b32.xlu0 %v572_v6, %s3647_s28 }
  0x1d   : > { %751 = vrot.lane.b32.xlu1 %v741_v8, %s3648_s29 }
  0x1f   : > { %749 = vrot.lane.b32.xlu0 %v746_v10, %s3648_s29  ;;  %v3388_v10 = vld [vmem:[%s4036_s2 + $0x38] sm:$0xff] }
  0x21   : > { %918 = vrot.lane.b32.xlu1 %v915_v11, %s3649_s30 }
  0x23   : > { %747 = vrot.lane.b32.xlu0 %v740_v7, %s3648_s29 }
  0x25   : > { %916 = vrot.lane.b32.xlu1 %v909_v9, %s3649_s30 }
  0x27   : > { %920 = vrot.lane.b32.xlu0 %v910_v12, %s3649_s30 }
  0x29   : > { %1089 = vrot.lane.b32.xlu1 %v1079_v14, %s3650_s7 }
  0x2b   : > { %1087 = vrot.lane.b32.xlu0 %v1084_v16, %s3650_s7  ;;  %v3394_v16 = vld [vmem:[%s4036_s2 + $0x40] sm:$0xff] }
  0x2d   : > { %1257 = vrot.lane.b32.xlu1 %v1253_v17, %s3651_s8 }
  0x2f   : > { %1085 = vrot.lane.b32.xlu0 %v1078_v13, %s3650_s7 }
  0x31   : > { %1255 = vrot.lane.b32.xlu1 %v1247_v15, %s3651_s8 }
  0x33   : > { %1259 = vrot.lane.b32.xlu0 %v1248_v19, %s3651_s8 }
  0x35   : > { %1430 = vrot.lane.b32.xlu1 %v1426_v20, %s3652_s9 }
  0x37   : > { %1261 = vrot.lane.b32.xlu0 %v1254_v21, %s3651_s8 }
  0x39   : > { %1428 = vrot.lane.b32.xlu1 %v1420_v18, %s3652_s9 }
  0x3b   : > { %1432 = vrot.lane.b32.xlu0 %v1421_v23, %s3652_s9 }
  0x3d   : > { %1603 = vrot.lane.b32.xlu1 %v1599_v24, %s3653_s10 }
  0x3f   : > { %1434 = vrot.lane.b32.xlu0 %v1427_v26, %s3652_s9 }
  0x41   : > { %1607 = vrot.lane.b32.xlu1 %v1600_v27, %s3653_s10 }
  0x43   : > { %1605 = vrot.lane.b32.xlu0 %v1594_v25, %s3653_s10 }
  0x45   : > { %1769 = vperm.xlu1 %3611, %v1766_v28  }
  0x47   : > { %1601 = vrot.lane.b32.xlu0 %v1593_v22, %s3653_s10 }
  0x83   : > { %v261_v30 = vpop.permute.xlu1 %260 }
  0x85   : > { %v263_v31 = vpop.permute.xlu0 %262 }
  0x86   : > { %v267_v36 = vsel %vm266_vm2, %v261_v30, %v263_v31 }
  0x87   : > { %v581_v32 = vpop.permute.xlu1 %580 }
  0x89   : > { %v265_v33 = vpop.permute.xlu0 %264 }
  0x8a   : > { %3469 = vmatpush3.msk.msra.mxu1 %vm273_vm1, %v265_v33  ;;  %v268_v34 = vsel %vm266_vm2, %v263_v31, %v265_v33 }
  0x8b   : > { %3348 = vmatprep.subr.msk.mxu0 %vm273_vm1, %v268_v34  ;;  %v579_v37 = vpop.permute.xlu1 %578  ;;  %3471 = vmatmul.mubr.msk.f32.vlgmr.msra.gmra.mrb[0].mxu1 %vm269_vm3, %v3347_v35 }
  0x8c   : > { %3349 = vmatpush1.msk.msra.mxu0 %vm273_vm1, %v267_v36  ;;  %3473 = vmatprep.subr.mxu1 %v3644_v0  ;;  %v585_v43 = vsel %vm584_vm4, %v579_v37, %v581_v32 }
  0x8d   : > { %3350 = vmatmul.mubr.msk.f32.vlgmr.msra.gmra.mrb[0].mxu0 %vm269_vm3, %v3347_v35  ;;  %v583_v38 = vpop.permute.xlu0 %582  ;;  %3353 = vmatprep.subr.msk.mxu0 %vm273_vm1, %v3719_v3 }
  0x8e   : > { %v586_v39 = vsel %vm584_vm4, %v581_v32, %v583_v38  ;;  %3354 = vmatpush1.msk.msra.mxu0 %vm273_vm1, %v3712_v1  ;;  %494 = vmatprep.mubr.f32.mxu0 %v3644_v0 }
  0x8f   : > { %v752_v40 = vpop.permute.xlu1 %751  ;;  %3474 = vmatpush3.msk.msra.mxu1 %vm273_vm1, %v3724_v5  ;;  %3359 = vmatprep.subr.msk.mxu0 %vm273_vm1, %v586_v39 }
  0x90   : > { %3475 = vmatprep.mubr.msk.f32.mxu1 %vm3645_vm0, %v3644_v0  ;;  %3478 = vmatprep.subr.mxu1 %v3644_v0 }
  0x91   : > { %v750_v42 = vpop.permute.xlu0 %749  ;;  %3476 = vmatmul.mubr.msk.f32.vlgmr.msra.gmra.mrb[2].mxu1 %vm269_vm3, %v254_v41 }
  0x92   : > { %3479 = vmatpush3.msk.msra.mxu1 %vm273_vm1, %v583_v38  ;;  %3480 = vmatprep.mubr.msk.f32.mxu1 %vm3645_vm0, %v3644_v0  ;;  %v755_v45 = vsel %vm753_vm5, %v750_v42, %v752_v40 }
  0x93   : > { %v919_v44 = vpop.permute.xlu1 %918  ;;  %3483 = vmatprep.subr.mxu1 %v3644_v0 }
  0x95   : > { %3355 = vmatmul.mubr.msk.f32.vlgmr.msra.gmra.mrb[0].mxu0 %vm269_vm3, %v254_v41  ;;  %v748_v47 = vpop.permute.xlu0 %747  ;;  %3481 = vmatmul.mubr.msk.f32.vlgmr.msra.gmra.mrb[4].mxu1 %vm269_vm3, %v3358_v46 }
  0x96   : > { %3360 = vmatpush1.msk.msra.mxu0 %vm273_vm1, %v585_v43  ;;  %660 = vmatprep.mubr.f32.mxu0 %v3644_v0  ;;  %v754_v52 = vsel %vm753_vm5, %v748_v47, %v750_v42  ;;  %v1780_v42 = vlaneseq }
  0x97   : > { %v917_v49 = vpop.permute.xlu1 %916  ;;  %3365 = vmatprep.subr.msk.mxu0 %vm273_vm1, %v755_v45  ;;  %3484 = vmatpush3.msk.msra.mxu1 %vm273_vm1, %v752_v40 }
  0x98   : > { %3485 = vmatprep.mubr.msk.f32.mxu1 %vm3645_vm0, %v3644_v0  ;;  %3488 = vmatprep.subr.mxu1 %v3644_v0  ;;  %v923_v59 = vsel %vm922_vm6, %v917_v49, %v919_v44  ;;  %v3898_v43 = vshrl.u32 %v1780_v42, 7  ;;  %v1778_v49 = vld [vmem:[%s4035_s1] sm:$0x7] }
  0x99   : > { %v921_v50 = vpop.permute.xlu0 %920  ;;  %3486 = vmatmul.mubr.msk.f32.vlgmr.msra.gmra.mrb[6].mxu1 %vm269_vm3, %v3364_v48 }
  0x9a   : > { %3489 = vmatpush3.msk.msra.mxu1 %vm273_vm1, %v921_v50  ;;  %3490 = vmatprep.mubr.msk.f32.mxu1 %vm3645_vm0, %v3644_v0  ;;  %v924_v54 = vsel %vm922_vm6, %v919_v44, %v921_v50  ;;  %v1790_v47 = vsub.s32 2, %v3898_v43 }
  0x9b   : > { %v1090_v53 = vpop.permute.xlu1 %1089  ;;  %3493 = vmatprep.subr.mxu1 %v3644_v0 }
  0x9d   : > { %3361 = vmatmul.mubr.msk.f32.vlgmr.msra.gmra.mrb[0].mxu0 %vm269_vm3, %v3358_v46  ;;  %v1088_v55 = vpop.permute.xlu0 %1087  ;;  %3491 = vmatmul.mubr.msk.f32.vlgmr.msra.gmra.mrb[8].mxu1 %vm269_vm3, %v3370_v51 }
  0x9e   : > { %3366 = vmatpush1.msk.msra.mxu0 %vm273_vm1, %v754_v52  ;;  %829 = vmatprep.mubr.f32.mxu0 %v3644_v0  ;;  %v1093_v61 = vsel %vm1091_vm7, %v1088_v55, %v1090_v53 }
  0x9f   : > { %v1258_v57 = vpop.permute.xlu1 %1257  ;;  %3371 = vmatprep.subr.msk.mxu0 %vm273_vm1, %v924_v54  ;;  %3494 = vmatpush3.msk.msra.mxu1 %vm273_vm1, %v1090_v53  ;;  %v1791_v53 = vrot.slane %v1778_v49, %v1790_v47 }
  0xa0   : > { %3495 = vmatprep.mubr.msk.f32.mxu1 %vm3645_vm0, %v3644_v0  ;;  %3498 = vmatprep.subr.mxu1 %v3644_v0 }
  0xa1   : > { %v1086_v58 = vpop.permute.xlu0 %1085  ;;  %3496 = vmatmul.mubr.msk.f32.vlgmr.msra.gmra.mrb[10].mxu1 %vm269_vm3, %v3376_v56 }
  0xa2   : > { %3500 = vmatprep.mubr.msk.f32.mxu1 %vm3645_vm0, %v3644_v0  ;;  %v1092_v4 = vsel %vm1091_vm7, %v1086_v58, %v1088_v55  ;;  %v1782_v58 = vsub.s32 0, %v3898_v43 }
  0xa3   : > { %v1256_v60 = vpop.permute.xlu1 %1255 }
  0xa4   : > { %v1264_v14 = vsel %vm1263_vm8, %v1256_v60, %v1258_v57 }
  0xa5   : > { %3367 = vmatmul.mubr.msk.f32.vlgmr.msra.gmra.mrb[0].mxu0 %vm269_vm3, %v3364_v48  ;;  %v1260_v62 = vpop.permute.xlu0 %1259 }
  0xa6   : > { %3372 = vmatpush1.msk.msra.mxu0 %vm273_vm1, %v923_v59  ;;  %998 = vmatprep.mubr.f32.mxu0 %v3644_v0  ;;  %v1265_v6 = vsel %vm1263_vm8, %v1258_v57, %v1260_v62  ;;  %v1786_v59 = vsub.s32 1, %v3898_v43 }
  0xa7   : > { %v1431_v63 = vpop.permute.xlu1 %1430  ;;  %3377 = vmatprep.subr.msk.mxu0 %vm273_vm1, %v1093_v61 }
  0xa9   : > { %v1262_v1 = vpop.permute.xlu0 %1261 }
  0xaa   : > { %v1266_v3 = vsel %vm1263_vm8, %v1260_v62, %v1262_v1  ;;  %v1783_v62 = vrot.slane %v1778_v49, %v1782_v58 }
  0xab   : > { %v1429_v5 = vpop.permute.xlu1 %1428  ;;  %3499 = vmatpush3.msk.msra.mxu1 %vm273_vm1, %v1266_v3 }
  0xac   : > { %3501 = vmatmul.mubr.msk.f32.vlgmr.msra.gmra.mrb[12].mxu1 %vm269_vm3, %v3382_v2  ;;  %3503 = vmatprep.subr.mxu1 %v3644_v0  ;;  %v1437_v19 = vsel %vm1436_vm9, %v1429_v5, %v1431_v63 }
  0xad   : > { %3373 = vmatmul.mubr.msk.f32.vlgmr.msra.gmra.mrb[0].mxu0 %vm269_vm3, %v3370_v51  ;;  %v1433_v7 = vpop.permute.xlu0 %1432  ;;  %3505 = vmatprep.mubr.msk.f32.mxu1 %vm3645_vm0, %v3644_v0 }
  0xae   : > { %3378 = vmatpush1.msk.msra.mxu0 %vm273_vm1, %v1092_v4  ;;  %1167 = vmatprep.mubr.f32.mxu0 %v3644_v0  ;;  %v1438_v13 = vsel %vm1436_vm9, %v1431_v63, %v1433_v7 }
  0xaf   : > { %v1604_v8 = vpop.permute.xlu1 %1603  ;;  %3383 = vmatprep.subr.msk.mxu0 %vm273_vm1, %v1265_v6 }
  0xb1   : > { %v1435_v9 = vpop.permute.xlu0 %1434 }
  0xb2   : > { %v1439_v11 = vsel %vm1436_vm9, %v1433_v7, %v1435_v9  ;;  %v3231_v7 = vld [vmem:[%s4039_s5] sm:$0x3] }
  0xb3   : > { %3504 = vmatpush3.msk.msra.mxu1 %vm273_vm1, %v1439_v11  ;;  %v1608_v12 = vpop.permute.xlu1 %1607 }
  0xb4   : > { %3506 = vmatmul.mubr.msk.f32.vlgmr.msra.gmra.mrb[14].mxu1 %vm269_vm3, %v3388_v10  ;;  %3508 = vmatprep.subr.mxu1 %v3644_v0 }
  0xb5   : > { %3379 = vmatmul.mubr.msk.f32.vlgmr.msra.gmra.mrb[0].mxu0 %vm269_vm3, %v3376_v56  ;;  %v1606_v15 = vpop.permute.xlu0 %1605  ;;  %3510 = vmatprep.mubr.msk.f32.mxu1 %vm3645_vm0, %v3644_v0 }
  0xb6   : > { %3384 = vmatpush1.msk.msra.mxu0 %vm273_vm1, %v1264_v14  ;;  %v1612_v17 = vsel %vm1609_vm10, %v1606_v15, %v1608_v12  ;;  %1340 = vmatprep.mubr.f32.mxu0 %v3644_v0  ;;  %v1611_v18 = vsel %vm1609_vm10, %v1604_v8, %v1606_v15 }
  0xb7   : > { %3509 = vmatpush3.msk.msra.mxu1 %vm273_vm1, %v1612_v17  ;;  %3389 = vmatprep.subr.msk.mxu0 %vm273_vm1, %v1438_v13 }
  0xb8   : > { %3511 = vmatmul.mubr.msk.f32.vlgmr.msra.gmra.mrb[16].mxu1 %vm269_vm3, %v3394_v16  ;;  %3513 = vmatprep.subr.mxu1 %v3644_v0 }
  0xb9   : > { %3515 = vmatprep.mubr.msk.f32.mxu1 %vm3645_vm0, %v3644_v0  ;;  %v1602_v20 = vpop.permute.xlu0 %1601 }
  0xba   : > { %v1610_v21 = vsel %vm1609_vm10, %v1602_v20, %v1604_v8  ;;  %v3400_v8 = vld [vmem:[%s4038_s4 + $0x2] sm:$0x3] }
  0xbd   : > { %3385 = vmatmul.mubr.msk.f32.vlgmr.msra.gmra.mrb[0].mxu0 %vm269_vm3, %v3382_v2  ;;  %v1787_v2 = vrot.slane %v1778_v49, %v1786_v59  ;;  %v3423_v49 = vld [vmem:[%s4038_s4 + $0x10] sm:$0x3] }
  0xbe   : > { %3390 = vmatpush1.msk.msra.mxu0 %vm273_vm1, %v1437_v19  ;;  %1513 = vmatprep.mubr.f32.mxu0 %v3644_v0  ;;  %v3405_v19 = vld [vmem:[%s4038_s4 + $0x4] sm:$0x3] }
  0xbf   : > { %3395 = vmatprep.subr.msk.mxu0 %vm273_vm1, %v1611_v18 }
  0xc4   : > { %v1770_v50 = vpop.permute.xlu1 %1769 }
  0xc5   : > { %3391 = vmatmul.mubr.msk.f32.vlgmr.msra.gmra.mrb[0].mxu0 %vm269_vm3, %v3388_v10  ;;  %v1805_v10 = vld [vmem:[%s4038_s4] sm:$0x3] }
  0xc6   : > { %3396 = vmatpush1.msk.msra.mxu0 %vm273_vm1, %v1610_v21  ;;  %1686 = vmatprep.mubr.f32.mxu0 %v3644_v0 }
  0xcd   : > { %3397 = vmatmul.mubr.msk.f32.vlgmr.msra.gmra.mrb[0].mxu0 %vm269_vm3, %v3394_v16 }
  0xce   : > { %1890 = vmatprep.mubr.f32.mxu0 %v3644_v0 }
 0x15e   : > { %v417_v22 = vpop.f32.mrb[0].mxu1 }
 0x15f   : > { %v3472_v23 = vpop.f32.mrb[1].mxu1 }
 0x160   : > { %v3408_v23 = vld [vmem:[%s4038_s4 + $0x6] sm:$0x3] }
 0x164   : > { %v567_v24 = vpop.f32.mrb[2].mxu1 }
 0x165   : > { %v568_v25 = vadd.f32 %v567_v24, %v417_v22  ;;  %v3477_v26 = vpop.f32.mrb[3].mxu1 }
 0x168   : > { %v733_v27 = vpop.f32.mrb[4].mxu1 }
 0x169   : > { %v739_v28 = vadd.f32 %v733_v27, %v568_v25  ;;  %v3482_v29 = vpop.f32.mrb[5].mxu1 }
 0x16c   : > { %v902_v30 = vpop.f32.mrb[6].mxu1 }
 0x16d   : > { %v908_v31 = vadd.f32 %v902_v30, %v739_v28  ;;  %v3487_v32 = vpop.f32.mrb[7].mxu1  ;;  %v3411_v28 = vld [vmem:[%s4038_s4 + $0x8] sm:$0x3] }
 0x16e   : > { %v3414_v32 = vld [vmem:[%s4038_s4 + $0xa] sm:$0x3] }
 0x170   : > { %v1071_v33 = vpop.f32.mrb[8].mxu1 }
 0x171   : > { %v1077_v34 = vadd.f32 %v1071_v33, %v908_v31  ;;  %v3492_v35 = vpop.f32.mrb[9].mxu1 }
 0x174   : > { %v1240_v36 = vpop.f32.mrb[10].mxu1 }
 0x175   : > { %v1246_v37 = vadd.f32 %v1240_v36, %v1077_v34  ;;  %v3497_v38 = vpop.f32.mrb[11].mxu1 }
 0x17f   : > { %v1413_v39 = vpop.f32.mrb[12].mxu1 }
 0x180   : > { %v1419_v40 = vadd.f32 %v1413_v39, %v1246_v37  ;;  %v3502_v41 = vpop.f32.mrb[13].mxu1  ;;  %v3417_v39 = vld [vmem:[%s4038_s4 + $0xc] sm:$0x3] }
 0x187   : > { %v1586_v44 = vpop.f32.mrb[14].mxu1 }
 0x188   : > { %v1592_v45 = vadd.f32 %v1586_v44, %v1419_v40  ;;  %v3507_v46 = vpop.f32.mrb[15].mxu1  ;;  %v3420_v44 = vld [vmem:[%s4038_s4 + $0xe] sm:$0x3] }
 0x18b   : > { %v1759_v48 = vpop.f32.mrb[16].mxu1 }
 0x18c   : > { %v1765_v51 = vadd.f32 %v1759_v48, %v1592_v45  ;;  %v3512_v52 = vpop.f32.mrb[17].mxu1 }
 0x18e   : > { %v1774_v54 = vadd.f32 %v1770_v50, %v1765_v51 }
 0x190   : > { %v1777_v55 = vmax.f32 %v1774_v54, 0.0 }
 0x192   : > { %v1797_v56 = vmul.f32 %v1791_v53, %v1777_v55 }
 0x194   : > { %1801 = vst.msk [vmem:[#allocation2 + $0x10] sm:$0xff] %vm1800_vm11, %v1797_v56 }
 0x19b   : > { %v1804_v57 = vld [vmem:[#allocation2 + $0x10] sm:$0xff] }
 0x19c   : > { %1815 = vrot.lane.b32.xlu1 %v1804_v57, %s3646_s27 }
 0x1a0   : > { %v1688_v60 = vpop.f32.mrb[0].mxu0 }
 0x1a1   : > { %v1772_v61 = vadd.f32 %v1770_v50, %v1688_v60  ;;  %v1690_v63 = vpop.f32.mrb[1].mxu0 }
 0x1a2   : > { %v1773_v1 = vadd.f32 %v1770_v50, %v1690_v63 }
 0x1a3   : > { %v1775_v3 = vmax.f32 %v1772_v61, 0.0 }
 0x1a4   : > { %v1776_v4 = vmax.f32 %v1773_v1, 0.0 }
 0x1a5   : > { %v1795_v5 = vmul.f32 %v1783_v62, %v1775_v3 }
 0x1a6   : > { %v1796_v6 = vmul.f32 %v1787_v2, %v1776_v4 }
 0x1a8   : > { %2115 = vrot.lane.b32.xlu1 %v1796_v6, %s3647_s28  ;;  %1813 = vrot.lane.b32.xlu0 %v1796_v6, %s3646_s27 }
 0x1ac   : > { %2113 = vrot.lane.b32.xlu1 %v1795_v5, %s3647_s28  ;;  %1811 = vrot.lane.b32.xlu0 %v1795_v5, %s3646_s27 }
 0x1b0   : > { %2277 = vrot.lane.b32.xlu1 %v1804_v57, %s3648_s29  ;;  %2117 = vrot.lane.b32.xlu0 %v1804_v57, %s3647_s28  ;;  %s251_s28 = scalar_lea.vmem %s4040_s6, %s3590_s17 }
 0x1b4   : > { %2435 = vrot.lane.b32.xlu1 %v1796_v6, %s3649_s30  ;;  %2275 = vrot.lane.b32.xlu0 %v1796_v6, %s3648_s29 }
 0x1b8   : > { %2433 = vrot.lane.b32.xlu1 %v1795_v5, %s3649_s30  ;;  %2273 = vrot.lane.b32.xlu0 %v1795_v5, %s3648_s29 }
 0x1bc   : > { %2597 = vrot.lane.b32.xlu1 %v1804_v57, %s3650_s7  ;;  %2437 = vrot.lane.b32.xlu0 %v1804_v57, %s3649_s30 }
 0x1c0   : > { %2755 = vrot.lane.b32.xlu1 %v1796_v6, %s3651_s8  ;;  %2595 = vrot.lane.b32.xlu0 %v1796_v6, %s3650_s7 }
 0x1c4   : > { %2753 = vrot.lane.b32.xlu1 %v1795_v5, %s3651_s8  ;;  %2593 = vrot.lane.b32.xlu0 %v1795_v5, %s3650_s7 }
 0x1c8   : > { %2917 = vrot.lane.b32.xlu1 %v1804_v57, %s3652_s9  ;;  %2757 = vrot.lane.b32.xlu0 %v1804_v57, %s3651_s8 }
 0x1cc   : > { %3075 = vrot.lane.b32.xlu1 %v1796_v6, %s3653_s10  ;;  %2915 = vrot.lane.b32.xlu0 %v1796_v6, %s3652_s9 }
 0x1d0   : > { %3073 = vrot.lane.b32.xlu1 %v1795_v5, %s3653_s10  ;;  %2913 = vrot.lane.b32.xlu0 %v1795_v5, %s3652_s9 }
 0x1d4   : > { %3077 = vrot.lane.b32.xlu0 %v1804_v57, %s3653_s10 }
 0x1d8   : > { %3234 = vperm.xlu0 %3612, %v3231_v7  }
 0x20e   : > { %v1816_v9 = vpop.permute.xlu1 %1815 }
 0x20f   : > { %3514 = vmatpush3.msra.mxu1 %v1816_v9 }
 0x210   : > { %3518 = vmatprep.subr.mxu1 %v3644_v0  ;;  %3516 = vmatmul.mubr.msk.f32.vlgmr.msra.gmra.mrb[18].mxu1 %vm1822_vm12, %v3400_v8 }
 0x211   : > { %3519 = vmatpush3.msra.mxu1 %v1804_v57  ;;  %3520 = vmatprep.mubr.msk.f32.mxu1 %vm3645_vm0, %v3644_v0 }
 0x212   : > { %3523 = vmatprep.subr.mxu1 %v3644_v0 }
 0x214   : > { %3521 = vmatmul.mubr.msk.f32.vlgmr.msra.gmra.mrb[20].mxu1 %vm1822_vm12, %v1805_v10 }
 0x215   : > { %3525 = vmatprep.mubr.msk.f32.mxu1 %vm3645_vm0, %v3644_v0 }
 0x21a   : > { %v2116_v11 = vpop.permute.xlu1 %2115  ;;  %v1814_v12 = vpop.permute.xlu0 %1813 }
 0x21b   : > { %v1818_v13 = vsel %vm266_vm2, %v1814_v12, %v1816_v9 }
 0x21c   : > { %1826 = vmatprep.subr.mxu0 %v1818_v13 }
 0x21e   : > { %v2114_v14 = vpop.permute.xlu1 %2113  ;;  %v1812_v15 = vpop.permute.xlu0 %1811 }
 0x21f   : > { %v1817_v16 = vsel %vm266_vm2, %v1812_v15, %v1814_v12  ;;  %v2119_v24 = vsel %vm584_vm4, %v2114_v14, %v2116_v11 }
 0x220   : > { %1827 = vmatpush1.msra.mxu0 %v1817_v16 }
 0x221   : > { %3401 = vmatmul.mubr.msk.f32.vlgmr.msra.gmra.mrb[2].mxu0 %vm1822_vm12, %v3400_v8  ;;  %1970 = vmatprep.subr.mxu0 %v1796_v6 }
 0x222   : > { %v2278_v17 = vpop.permute.xlu1 %2277  ;;  %1971 = vmatpush1.msra.mxu0 %v1795_v5  ;;  %v2118_v18 = vpop.permute.xlu0 %2117  ;;  %2034 = vmatprep.mubr.f32.mxu0 %v3644_v0 }
 0x223   : > { %3524 = vmatpush3.msra.mxu1 %v2118_v18  ;;  %v2120_v20 = vsel %vm584_vm4, %v2116_v11, %v2118_v18 }
 0x224   : > { %2127 = vmatprep.subr.mxu0 %v2120_v20  ;;  %3528 = vmatprep.subr.mxu1 %v3644_v0 }
 0x225   : > { %3526 = vmatmul.mubr.msk.f32.vlgmr.msra.gmra.mrb[22].mxu1 %vm1822_vm12, %v3405_v19 }
 0x226   : > { %3529 = vmatpush3.msra.mxu1 %v2278_v17  ;;  %v2436_v21 = vpop.permute.xlu1 %2435  ;;  %v2276_v22 = vpop.permute.xlu0 %2275  ;;  %3530 = vmatprep.mubr.msk.f32.mxu1 %vm3645_vm0, %v3644_v0 }
 0x227   : > { %3533 = vmatprep.subr.mxu1 %v3644_v0  ;;  %v2280_v26 = vsel %vm753_vm5, %v2276_v22, %v2278_v17 }
 0x229   : > { %3403 = vmatmul.mubr.msk.f32.vlgmr.msra.gmra.mrb[2].mxu0 %vm1822_vm12, %v1805_v10  ;;  %3531 = vmatmul.mubr.msk.f32.vlgmr.msra.gmra.mrb[24].mxu1 %vm1822_vm12, %v3408_v23 }
 0x22a   : > { %2128 = vmatpush1.msra.mxu0 %v2119_v24  ;;  %v2434_v25 = vpop.permute.xlu1 %2433  ;;  %v2274_v27 = vpop.permute.xlu0 %2273  ;;  %2191 = vmatprep.mubr.f32.mxu0 %v3644_v0 }
 0x22b   : > { %2287 = vmatprep.subr.mxu0 %v2280_v26  ;;  %3535 = vmatprep.mubr.msk.f32.mxu1 %vm3645_vm0, %v3644_v0  ;;  %v2279_v31 = vsel %vm753_vm5, %v2274_v27, %v2276_v22  ;;  %v2439_v38 = vsel %vm922_vm6, %v2434_v25, %v2436_v21 }
 0x22e   : > { %v2598_v29 = vpop.permute.xlu1 %2597  ;;  %v2438_v30 = vpop.permute.xlu0 %2437 }
 0x22f   : > { %3534 = vmatpush3.msra.mxu1 %v2438_v30  ;;  %v2440_v34 = vsel %vm922_vm6, %v2436_v21, %v2438_v30 }
 0x230   : > { %3538 = vmatprep.subr.mxu1 %v3644_v0  ;;  %3536 = vmatmul.mubr.msk.f32.vlgmr.msra.gmra.mrb[26].mxu1 %vm1822_vm12, %v3411_v28 }
 0x231   : > { %3406 = vmatmul.mubr.msk.f32.vlgmr.msra.gmra.mrb[2].mxu0 %vm1822_vm12, %v3405_v19  ;;  %3539 = vmatpush3.msra.mxu1 %v2598_v29 }
 0x232   : > { %2288 = vmatpush1.msra.mxu0 %v2279_v31  ;;  %v2756_v33 = vpop.permute.xlu1 %2755  ;;  %v2596_v35 = vpop.permute.xlu0 %2595  ;;  %2351 = vmatprep.mubr.f32.mxu0 %v3644_v0 }
 0x233   : > { %2447 = vmatprep.subr.mxu0 %v2440_v34  ;;  %3540 = vmatprep.mubr.msk.f32.mxu1 %vm3645_vm0, %v3644_v0  ;;  %v2600_v40 = vsel %vm1091_vm7, %v2596_v35, %v2598_v29 }
 0x234   : > { %3541 = vmatmul.mubr.msk.f32.vlgmr.msra.gmra.mrb[28].mxu1 %vm1822_vm12, %v3414_v32  ;;  %3543 = vmatprep.subr.mxu1 %v3644_v0 }
 0x235   : > { %3545 = vmatprep.mubr.msk.f32.mxu1 %vm3645_vm0, %v3644_v0 }
 0x236   : > { %v2754_v36 = vpop.permute.xlu1 %2753  ;;  %v2594_v37 = vpop.permute.xlu0 %2593 }
 0x237   : > { %v2599_v46 = vsel %vm1091_vm7, %v2594_v37, %v2596_v35  ;;  %v2759_v51 = vsel %vm1263_vm8, %v2754_v36, %v2756_v33  ;;  %v3655_v35 = vmov 1983009808  }
 0x238   : > { %v3263_v36 = vunpack.c.l.s4 %v3655_v35 }
 0x239   : > { %3409 = vmatmul.mubr.msk.f32.vlgmr.msra.gmra.mrb[2].mxu0 %vm1822_vm12, %v3408_v23 }
 0x23a   : > { %2448 = vmatpush1.msra.mxu0 %v2439_v38  ;;  %v2758_v41 = vpop.permute.xlu0 %2757  ;;  %2511 = vmatprep.mubr.f32.mxu0 %v3644_v0  ;;  %v2918_v42 = vpop.permute.xlu1 %2917  ;;  %v3264_v37 = vunpack.c.0.s8 %v3263_v36 }
 0x23b   : > { %2607 = vmatprep.subr.mxu0 %v2600_v40  ;;  %3544 = vmatpush3.msra.mxu1 %v2758_v41  ;;  %v2760_v47 = vsel %vm1263_vm8, %v2756_v33, %v2758_v41 }
 0x23c   : > { %3548 = vmatprep.subr.mxu1 %v3644_v0  ;;  %3546 = vmatmul.mubr.msk.f32.vlgmr.msra.gmra.mrb[30].mxu1 %vm1822_vm12, %v3417_v39  ;;  %v3267_v40 = vsub.s32 %v3264_v37, %v3898_v43 }
 0x23d   : > { %3549 = vmatpush3.msra.mxu1 %v2918_v42  ;;  %3550 = vmatprep.mubr.msk.f32.mxu1 %vm3645_vm0, %v3644_v0 }
 0x23e   : > { %v2916_v45 = vpop.permute.xlu0 %2915  ;;  %3553 = vmatprep.subr.mxu1 %v3644_v0  ;;  %v3076_v53 = vpop.permute.xlu1 %3075 }
 0x23f   : > { %v2920_v52 = vsel %vm1436_vm9, %v2916_v45, %v2918_v42 }
 0x240   : > { %3551 = vmatmul.mubr.msk.f32.vlgmr.msra.gmra.mrb[32].mxu1 %vm1822_vm12, %v3420_v44 }
 0x241   : > { %3412 = vmatmul.mubr.msk.f32.vlgmr.msra.gmra.mrb[2].mxu0 %vm1822_vm12, %v3411_v28  ;;  %3555 = vmatprep.mubr.msk.f32.mxu1 %vm3645_vm0, %v3644_v0  ;;  %vm3281_vm0 = vcmask 553988  }
 0x242   : > { %2608 = vmatpush1.msra.mxu0 %v2599_v46  ;;  %v2914_v48 = vpop.permute.xlu0 %2913  ;;  %2671 = vmatprep.mubr.f32.mxu0 %v3644_v0  ;;  %v3074_v56 = vpop.permute.xlu1 %3073  ;;  %vm3282_vm1 = vmor %vm3281_vm0, %vm3280_vm15 }
 0x243   : > { %2767 = vmatprep.subr.mxu0 %v2760_v47  ;;  %v2919_v54 = vsel %vm1436_vm9, %v2914_v48, %v2916_v45  ;;  %v3079_v57 = vsel %vm1609_vm10, %v3074_v56, %v3076_v53 }
 0x246   : > { %v3078_v50 = vpop.permute.xlu0 %3077 }
 0x247   : > { %3554 = vmatpush3.msra.mxu1 %v3078_v50  ;;  %v3080_v55 = vsel %vm1609_vm10, %v3076_v53, %v3078_v50 }
 0x248   : > { %3556 = vmatmul.mubr.msk.f32.vlgmr.msra.gmra.mrb[34].mxu1 %vm1822_vm12, %v3423_v49 }
 0x249   : > { %3415 = vmatmul.mubr.msk.f32.vlgmr.msra.gmra.mrb[2].mxu0 %vm1822_vm12, %v3414_v32 }
 0x24a   : > { %2768 = vmatpush1.msra.mxu0 %v2759_v51  ;;  %2831 = vmatprep.mubr.f32.mxu0 %v3644_v0 }
 0x24b   : > { %2927 = vmatprep.subr.mxu0 %v2920_v52 }
 0x251   : > { %3418 = vmatmul.mubr.msk.f32.vlgmr.msra.gmra.mrb[2].mxu0 %vm1822_vm12, %v3417_v39 }
 0x252   : > { %2928 = vmatpush1.msra.mxu0 %v2919_v54  ;;  %2991 = vmatprep.mubr.f32.mxu0 %v3644_v0 }
 0x253   : > { %3087 = vmatprep.subr.mxu0 %v3080_v55 }
 0x257   : > { %v3235_v20 = vpop.permute.xlu0 %3234 }
 0x259   : > { %3421 = vmatmul.mubr.msk.f32.vlgmr.msra.gmra.mrb[2].mxu0 %vm1822_vm12, %v3420_v44 }
 0x25a   : > { %3088 = vmatpush1.msra.mxu0 %v3079_v57  ;;  %3151 = vmatprep.mubr.f32.mxu0 %v3644_v0 }
 0x261   : > { %3424 = vmatmul.mubr.msk.f32.vlgmr.msra.gmra.mrb[2].mxu0 %vm1822_vm12, %v3423_v49 }
 0x2e3   : > { %v1963_v58 = vpop.f32.mrb[18].mxu1 }
 0x2e4   : > { %v3517_v59 = vpop.f32.mrb[19].mxu1 }
 0x2e7   : > { %v2107_v60 = vpop.f32.mrb[20].mxu1 }
 0x2e8   : > { %v2108_v61 = vadd.f32 %v2107_v60, %v1963_v58  ;;  %v3522_v62 = vpop.f32.mrb[21].mxu1 }
 0x2f8   : > { %v2264_v63 = vpop.f32.mrb[22].mxu1 }
 0x2f9   : > { %v2270_v1 = vadd.f32 %v2264_v63, %v2108_v61  ;;  %v3527_v2 = vpop.f32.mrb[23].mxu1 }
 0x2fc   : > { %v2424_v3 = vpop.f32.mrb[24].mxu1 }
 0x2fd   : > { %v2430_v4 = vadd.f32 %v2424_v3, %v2270_v1  ;;  %v3532_v5 = vpop.f32.mrb[25].mxu1 }
 0x303   : > { %v2584_v6 = vpop.f32.mrb[26].mxu1 }
 0x304   : > { %v2590_v7 = vadd.f32 %v2584_v6, %v2430_v4  ;;  %v3537_v8 = vpop.f32.mrb[27].mxu1 }
 0x307   : > { %v2744_v9 = vpop.f32.mrb[28].mxu1 }
 0x308   : > { %v2750_v10 = vadd.f32 %v2744_v9, %v2590_v7  ;;  %v3542_v11 = vpop.f32.mrb[29].mxu1 }
 0x30f   : > { %v2904_v0 = vpop.f32.mrb[30].mxu1 }
 0x310   : > { %v2910_v12 = vadd.f32 %v2904_v0, %v2750_v10  ;;  %v3547_v13 = vpop.f32.mrb[31].mxu1 }
 0x313   : > { %v3064_v14 = vpop.f32.mrb[32].mxu1 }
 0x314   : > { %v3070_v15 = vadd.f32 %v3064_v14, %v2910_v12  ;;  %v3552_v16 = vpop.f32.mrb[33].mxu1 }
 0x31b   : > { %v3224_v17 = vpop.f32.mrb[34].mxu1 }
 0x31c   : > { %v3230_v18 = vadd.f32 %v3224_v17, %v3070_v15  ;;  %v3557_v19 = vpop.f32.mrb[35].mxu1 }
 0x31e   : > { %v3239_v21 = vadd.f32 %v3235_v20, %v3230_v18 }
 0x320   : > { %v3428_v22 = vmul.f32 -1.442695, %v3239_v21 }
 0x322   : > { %3624 = vpow2.f32 %v3428_v22 }
 0x32c   : > { %v3625_v29 = vpop.eup %3624 }
 0x32d   : > { %v3251_v30 = vadd.f32 1.0, %v3625_v29 }
 0x334   : > { %v3153_v23 = vpop.f32.mrb[2].mxu0 }
 0x335   : > { %v3237_v24 = vadd.f32 %v3235_v20, %v3153_v23  ;;  %v3155_v25 = vpop.f32.mrb[3].mxu0 }
 0x336   : > { %v3238_v26 = vadd.f32 %v3235_v20, %v3155_v25 }
 0x337   : > { %v3426_v27 = vmul.f32 -1.442695, %v3237_v24 }
 0x338   : > { %v3427_v28 = vmul.f32 -1.442695, %v3238_v26 }
 0x339   : > { %3626 = vpow2.f32 %v3426_v27 }
 0x33a   : > { %3628 = vpow2.f32 %v3427_v28 }
 0x33b   : > { %3630 = vrcp.f32 %v3251_v30 }
 0x343   : > { %v3627_v31 = vpop.eup %3626 }
 0x344   : > { %v3629_v32 = vpop.eup %3628  ;;  %v3249_v33 = vadd.f32 1.0, %v3627_v31 }
 0x345   : > { %v3250_v34 = vadd.f32 1.0, %v3629_v32  ;;  %v3631_v38 = vpop.eup %3630 }
 0x346   : > { %3632 = vrcp.f32 %v3249_v33  ;;  %v3275_v44 = vrot.slane %v3631_v38, %v3267_v40 }
 0x347   : > { %3634 = vrcp.f32 %v3250_v34 }
 0x350   : > { %v3633_v39 = vpop.eup %3632 }
 0x351   : > { %v3635_v41 = vpop.eup %3634 }
 0x352   : > { %v3261_v42 = vcombine.low %v3633_v39, %v3635_v41 }
 0x354   : > { %v3268_v45 = vrot.slane %v3261_v42, %v3267_v40 }
 0x356   : > { %v3276_v46 = vcombine.low %v3268_v45, %v3275_v44 }
 0x358   : > { %3283 = vst.msk [vmem:[%s251_s28] sm:$0x3f] %vm3282_vm1, %v3276_v46 }
 0x359 PF: > { %s16_s21 = sadd.s32 1, %s3642_s21  }
 0x35a   : > { %p13_p4 = scmp.ge.s32.totalorder %s16_s21, 8  }
 0x35c   :  { %15 = sbr.rel (!%p13_p4) target bundleno = 1 (0x1), region = 90 }

</bundles_post_ra>
